<compile_context>
chip_gen: v6e
topology: v6e:2x2x1
jax: 0.10.0
libtpu: 0.0.40
codegen_flags: <defaults>
</compile_context>

<pallas_src>
import functools

import jax
import jax.numpy as jnp
from jax.experimental import pallas as pl
from jax.experimental.pallas import tpu as pltpu


def _round_up(v, m):
    return (v + m - 1) // m * m


def _iclassifier_kernel(x_ref, wconv_ref, bconv_ref, wfc_ref, bfc_ref,
                        feats_ref, logits_ref, *, tn, hw, fp):
    # One grid step processes `tn` samples.
    #   x_ref:      (tn*hw, C)   flattened NHWC tile, channels NOT padded
    #   wconv_ref:  (C, fp)      pre-transposed, lane-padded 1x1 conv weight
    #   bconv_ref:  (1, fp)      conv bias
    #   wfc_ref:    (fp, op)     pre-transposed, lane-padded fc weight
    #   bfc_ref:    (1, op)      fc bias
    #   feats_ref:  (tn, fp)     pooled features (lane-dense store)
    #   logits_ref: (tn, op)     class scores   (lane-dense store)

    # 1x1 conv as one lane-dense MXU matmul (tiny unpadded K), bias + ReLU
    # on the VPU.
    fm = jnp.dot(x_ref[...], wconv_ref[...],
                 preferred_element_type=jnp.float32)          # (tn*hw, fp)
    fm = jnp.maximum(fm + bconv_ref[...], 0.0)

    # Global average pool: per-sample sum over the hw spatial rows (sublane
    # reduction; hw is a multiple of 8 so the reshape keeps (8,128) tiling),
    # mean divide folded into a single constant multiply.
    pooled = jnp.sum(fm.reshape(tn, hw, fp), axis=1) * jnp.float32(1.0 / hw)
    feats_ref[...] = pooled.astype(feats_ref.dtype)

    # fc head: Linear(feature_size, output_class).
    logits = jnp.dot(pooled, wfc_ref[...],
                     preferred_element_type=jnp.float32) + bfc_ref[...]
    logits_ref[...] = logits.astype(logits_ref.dtype)


@functools.partial(jax.jit, static_argnames=("tn",))
def iclassifier_forward(x_nchw, w_conv, b_conv, w_fc, b_fc, *, tn=32):
    """x_nchw: (N, C, H, W) f32.  Returns (feats (N, F), logits (N, O))."""
    n, c, h, w = x_nchw.shape
    f = w_conv.shape[0]
    o = w_fc.shape[0]
    hw = h * w

    # Lane-dense padded output sizes (multiples of 128); contraction dim C is
    # deliberately left unpadded.
    fp = _round_up(f, 128)
    op = _round_up(o, 128)

    # Batch tile: multiple of 8 (sublane), and capped so the grid has at
    # least 2 steps once N allows it (so v7x's second TensorCore isn't idle).
    tn_eff = _round_up(max(8, min(tn, -(-n // 2))), 8)
    n_pad = _round_up(n, tn_eff)
    block_rows = tn_eff * hw

    # --- wrapper-side layout plumbing (small, one-time XLA ops) -------------
    # NCHW -> (N*HW, C); zero-pad only the (tiny) batch remainder rows.
    x_flat = jnp.transpose(x_nchw, (0, 2, 3, 1)).reshape(n * hw, c)
    if n_pad != n:
        x_flat = jnp.pad(x_flat, ((0, (n_pad - n) * hw), (0, 0)))
    x_flat = x_flat.astype(jnp.float32)

    # Pre-transposed, lane-padded weights (no in-kernel .T / relayout).
    w_conv_p = jnp.zeros((c, fp), jnp.float32).at[:, :f].set(
        w_conv.T.astype(jnp.float32))
    b_conv_p = jnp.zeros((1, fp), jnp.float32).at[0, :f].set(
        b_conv.astype(jnp.float32))
    w_fc_p = jnp.zeros((fp, op), jnp.float32).at[:f, :o].set(
        w_fc.T.astype(jnp.float32))
    b_fc_p = jnp.zeros((1, op), jnp.float32).at[0, :o].set(
        b_fc.astype(jnp.float32))

    grid = (n_pad // tn_eff,)

    # Explicit VMEM budget (v7x has only 64 MiB per TC, 32 MiB scoped
    # default): 2x x tile (double-buffered) + fm intermediate + resident
    # weights/bias + 2x output tiles, with 2x headroom.
    x_tile_b = block_rows * c * 4
    fm_b = block_rows * fp * 4
    wt_b = (c * fp + fp + fp * op + op) * 4
    out_b = (tn_eff * fp + tn_eff * op) * 4
    vmem_budget = 2 * x_tile_b + fm_b + wt_b + 2 * out_b
    vmem_limit = int(min(max(2 * vmem_budget, 16 * 1024 * 1024),
                         40 * 1024 * 1024))

    kernel = functools.partial(_iclassifier_kernel, tn=tn_eff, hw=hw, fp=fp)

    feats_p, logits_p = pl.pallas_call(
        kernel,
        out_shape=(
            jax.ShapeDtypeStruct((n_pad, fp), jnp.float32),
            jax.ShapeDtypeStruct((n_pad, op), jnp.float32),
        ),
        grid=grid,
        in_specs=[
            pl.BlockSpec((block_rows, c), lambda i: (i, 0)),   # x tile (pipelined)
            pl.BlockSpec((c, fp), lambda i: (0, 0)),           # conv W (resident)
            pl.BlockSpec((1, fp), lambda i: (0, 0)),           # conv b (resident)
            pl.BlockSpec((fp, op), lambda i: (0, 0)),          # fc   W (resident)
            pl.BlockSpec((1, op), lambda i: (0, 0)),           # fc   b (resident)
        ],
        out_specs=(
            pl.BlockSpec((tn_eff, fp), lambda i: (i, 0)),
            pl.BlockSpec((tn_eff, op), lambda i: (i, 0)),
        ),
        compiler_params=pltpu.CompilerParams(
            dimension_semantics=("parallel",),   # shard batch tiles on v7x's 2 TCs
            vmem_limit_bytes=vmem_limit,
        ),
    )(x_flat, w_conv_p, b_conv_p, w_fc_p, b_fc_p)

    # Strip batch / lane padding.
    return feats_p[:n, :f], logits_p[:n, :o]


def _reference(x_nchw, w_conv, b_conv, w_fc, b_fc):
    # pure-JAX reference of the same forward
    fm = jnp.einsum('nchw,fc->nfhw', x_nchw, w_conv) + b_conv[None, :, None, None]
    fm = jnp.maximum(fm, 0.0)
    feats = jnp.mean(fm, axis=(2, 3))                 # global avg pool -> (N, F)
    logits = feats @ w_fc.T + b_fc[None, :]
    return feats, logits


if __name__ == "__main__":
    # small shapes: batch=2, channels=4, spatial=16x16, feature_size=32, classes=3
    N, C, H, W = 2, 4, 16, 16
    FEATURE_SIZE, OUTPUT_CLASS = 32, 3

    key = jax.random.PRNGKey(0)
    kx, kwc, kbc, kwf, kbf = jax.random.split(key, 5)

    x = jax.random.normal(kx, (N, C, H, W), dtype=jnp.float32)
    w_conv = jax.random.normal(kwc, (FEATURE_SIZE, C), dtype=jnp.float32) * 0.1
    b_conv = jax.random.normal(kbc, (FEATURE_SIZE,), dtype=jnp.float32) * 0.1
    w_fc = jax.random.normal(kwf, (OUTPUT_CLASS, FEATURE_SIZE), dtype=jnp.float32) * 0.1
    b_fc = jax.random.normal(kbf, (OUTPUT_CLASS,), dtype=jnp.float32) * 0.1

    feats, logits = iclassifier_forward(x, w_conv, b_conv, w_fc, b_fc)
    jax.block_until_ready((feats, logits))

    ref_feats, ref_logits = _reference(x, w_conv, b_conv, w_fc, b_fc)
    assert feats.shape == (N, FEATURE_SIZE) and logits.shape == (N, OUTPUT_CLASS)
    assert jnp.allclose(feats, ref_feats, atol=1e-4, rtol=1e-4)
    assert jnp.allclose(logits, ref_logits, atol=1e-4, rtol=1e-4)

    print("KERNEL_OK")
</pallas_src>

<mosaic_0001>
module attributes {stable_mosaic.version = 11 : i64} {
  func.func @_iclassifier_kernel(%arg0: i32, %arg1: memref<2048x4xf32, #tpu.memory_space<vmem>>, %arg2: memref<4x128xf32, #tpu.memory_space<vmem>>, %arg3: memref<1x128xf32, #tpu.memory_space<vmem>>, %arg4: memref<128x128xf32, #tpu.memory_space<vmem>>, %arg5: memref<1x128xf32, #tpu.memory_space<vmem>>, %arg6: memref<8x128xf32, #tpu.memory_space<vmem>>, %arg7: memref<8x128xf32, #tpu.memory_space<vmem>>) attributes {dimension_semantics = [#tpu.dimension_semantics<parallel>], iteration_bounds = array<i64: 1>, scalar_prefetch = 0 : i64, scratch_operands = 0 : i64, tpu.core_type = #tpu.core_type<tc>, window_params = [{transform_indices = @transform_0, window_bounds = array<i64: 2048, 4>}, {pipeline_mode = #tpu.pipeline_mode<synchronous>, transform_indices = @transform_1, window_bounds = array<i64: 4, 128>}, {pipeline_mode = #tpu.pipeline_mode<synchronous>, transform_indices = @transform_2, window_bounds = array<i64: 1, 128>}, {pipeline_mode = #tpu.pipeline_mode<synchronous>, transform_indices = @transform_3, window_bounds = array<i64: 128, 128>}, {pipeline_mode = #tpu.pipeline_mode<synchronous>, transform_indices = @transform_4, window_bounds = array<i64: 1, 128>}, {transform_indices = @transform_5, window_bounds = array<i64: 8, 128>}, {transform_indices = @transform_6, window_bounds = array<i64: 8, 128>}]} {
    %c0 = arith.constant 0 : index
    %c0_0 = arith.constant 0 : index
    %0 = vector.load %arg1[%c0, %c0_0] : memref<2048x4xf32, #tpu.memory_space<vmem>>, vector<2048x4xf32>
    %c0_1 = arith.constant 0 : index
    %c0_2 = arith.constant 0 : index
    %1 = vector.load %arg2[%c0_1, %c0_2] : memref<4x128xf32, #tpu.memory_space<vmem>>, vector<4x128xf32>
    %cst = arith.constant dense<0.000000e+00> : vector<2048x128xf32>
    %2 = tpu.matmul %0, %1, %cst {dimension_numbers = #tpu.dot_dimension_numbers<[1], [0], [0], [1], [0, 0, 1, 1], [], []>} : vector<2048x4xf32>, vector<4x128xf32>, vector<2048x128xf32> -> vector<2048x128xf32>
    %c0_3 = arith.constant 0 : index
    %c0_4 = arith.constant 0 : index
    %3 = vector.load %arg3[%c0_3, %c0_4] : memref<1x128xf32, #tpu.memory_space<vmem>>, vector<1x128xf32>
    %4 = vector.broadcast %3 : vector<1x128xf32> to vector<2048x128xf32>
    %5 = arith.addf %2, %4 : vector<2048x128xf32>
    %cst_5 = arith.constant 0.000000e+00 : f32
    %6 = vector.broadcast %cst_5 : f32 to vector<2048x128xf32>
    %7 = arith.maximumf %5, %6 : vector<2048x128xf32>
    %8 = vector.shape_cast %7 : vector<2048x128xf32> to vector<8x256x128xf32>
    %cst_6 = arith.constant dense<0.000000e+00> : vector<8x128xf32>
    %9 = vector.multi_reduction <add>, %8, %cst_6 [1] : vector<8x256x128xf32> to vector<8x128xf32>
    %cst_7 = arith.constant 3.906250e-03 : f32
    %10 = vector.broadcast %cst_7 : f32 to vector<8x128xf32>
    %11 = arith.mulf %9, %10 : vector<8x128xf32>
    %c0_8 = arith.constant 0 : index
    %c0_9 = arith.constant 0 : index
    %12 = vector.load %arg6[%c0_8, %c0_9] : memref<8x128xf32, #tpu.memory_space<vmem>>, vector<8x128xf32>
    tpu.vector_store %arg6[%c0_8, %c0_9], %11 {strides = array<i32>} : memref<8x128xf32, #tpu.memory_space<vmem>>, vector<8x128xf32>,
    %c0_10 = arith.constant 0 : index
    %c0_11 = arith.constant 0 : index
    %13 = vector.load %arg4[%c0_10, %c0_11] : memref<128x128xf32, #tpu.memory_space<vmem>>, vector<128x128xf32>
    %cst_12 = arith.constant dense<0.000000e+00> : vector<8x128xf32>
    %14 = tpu.matmul %11, %13, %cst_12 {dimension_numbers = #tpu.dot_dimension_numbers<[1], [0], [0], [1], [0, 0, 1, 1], [], []>} : vector<8x128xf32>, vector<128x128xf32>, vector<8x128xf32> -> vector<8x128xf32>
    %c0_13 = arith.constant 0 : index
    %c0_14 = arith.constant 0 : index
    %15 = vector.load %arg5[%c0_13, %c0_14] : memref<1x128xf32, #tpu.memory_space<vmem>>, vector<1x128xf32>
    %16 = vector.broadcast %15 : vector<1x128xf32> to vector<8x128xf32>
    %17 = arith.addf %14, %16 : vector<8x128xf32>
    %c0_15 = arith.constant 0 : index
    %c0_16 = arith.constant 0 : index
    %18 = vector.load %arg7[%c0_15, %c0_16] : memref<8x128xf32, #tpu.memory_space<vmem>>, vector<8x128xf32>
    tpu.vector_store %arg7[%c0_15, %c0_16], %17 {strides = array<i32>} : memref<8x128xf32, #tpu.memory_space<vmem>>, vector<8x128xf32>,
    return
  }
  func.func @transform_0(%arg0: i32) -> (i32, i32) {
    %c0_i32 = arith.constant 0 : i32
    %c0_i32_0 = arith.constant 0 : i32
    return %arg0, %c0_i32 : i32, i32
  }
  func.func @transform_1(%arg0: i32) -> (i32, i32) {
    %c0_i32 = arith.constant 0 : i32
    %c0_i32_0 = arith.constant 0 : i32
    %c0_i32_1 = arith.constant 0 : i32
    return %c0_i32, %c0_i32_0 : i32, i32
  }
  func.func @transform_2(%arg0: i32) -> (i32, i32) {
    %c0_i32 = arith.constant 0 : i32
    %c0_i32_0 = arith.constant 0 : i32
    %c0_i32_1 = arith.constant 0 : i32
    return %c0_i32, %c0_i32_0 : i32, i32
  }
  func.func @transform_3(%arg0: i32) -> (i32, i32) {
    %c0_i32 = arith.constant 0 : i32
    %c0_i32_0 = arith.constant 0 : i32
    %c0_i32_1 = arith.constant 0 : i32
    return %c0_i32, %c0_i32_0 : i32, i32
  }
  func.func @transform_4(%arg0: i32) -> (i32, i32) {
    %c0_i32 = arith.constant 0 : i32
    %c0_i32_0 = arith.constant 0 : i32
    %c0_i32_1 = arith.constant 0 : i32
    return %c0_i32, %c0_i32_0 : i32, i32
  }
  func.func @transform_5(%arg0: i32) -> (i32, i32) {
    %c0_i32 = arith.constant 0 : i32
    %c0_i32_0 = arith.constant 0 : i32
    return %arg0, %c0_i32 : i32, i32
  }
  func.func @transform_6(%arg0: i32) -> (i32, i32) {
    %c0_i32 = arith.constant 0 : i32
    %c0_i32_0 = arith.constant 0 : i32
    return %arg0, %c0_i32 : i32, i32
  }
}

</mosaic_0001>

<bundles_post_ra>
// kernel: iclassifier_forward.1
= control target key start
LH: loop header
LB: loop body
LE: loop exit
PB: predicated region body
PF: predicated region fallthrough
CT: control target
= control target key end

     0   :  { %vm1055_vm0 = vcmask 1043456   ;;  %vm286_vm1 = vcmask 31744   ;;  %vm2972_vm2 = vcmask 1041409   ;;  %vm4051_vm3 = vmmov 0   ;;  %s5572_s1 = inlined_call_operand.vmem [shape: f32[4,128], index: 1, kind: input, shape index: {}]   ;;  %s5573_s0 = inlined_call_operand.vmem [shape: f32[2048,4], index: 0, kind: input, shape index: {}]   ;;  %s5574_s3 = inlined_call_operand.vmem [shape: f32[128,128], index: 3, kind: input, shape index: {}]   ;;  %s5575_s2 = inlined_call_operand.vmem [shape: f32[1,128], index: 2, kind: input, shape index: {}]   ;;  %s5576_s5 = inlined_call_operand.vmem [shape: f32[8,128], index: 5, kind: output, shape index: {0}]   ;;  %s5577_s4 = inlined_call_operand.vmem [shape: f32[1,128], index: 4, kind: input, shape index: {}]   ;;  %s5578_s6 = inlined_call_operand.vmem [shape: f32[8,128], index: 6, kind: output, shape index: {1}]  }
   0x1   :  { %v278_v0 = vld [vmem:[%s5572_s1] sm:$0xf]  ;;  %v23_v2 = vld [vmem:[%s5573_s0 + $0x8] sm:$0xff]  ;;  %v24_v3 = vld [vmem:[%s5573_s0 + $0x10] sm:$0xff]  ;;  %vm2974_vm4 = vcmask 1042434   ;;  %vm2976_vm5 = vcmask 1043459  }
   0x2   :  { %v22_v1 = vld [vmem:[%s5573_s0] sm:$0xff]  ;;  %3623 = vmatprep.subr.msk.mxu0 %vm1055_vm0, %v278_v0  ;;  %4044 = vmatprep.subr.msk.mxu1 %vm1055_vm0, %v278_v0  ;;  %v25_v4 = vld [vmem:[%s5573_s0 + $0x18] sm:$0xff]  ;;  %v27_v6 = vld [vmem:[%s5573_s0 + $0x28] sm:$0xff]  ;;  %vm2978_vm6 = vcmask 1044484   ;;  %vm2980_vm7 = vcmask 1045509   ;;  %vm2982_vm8 = vcmask 1046534  }
   0x3   :  { %3625 = vmatprep.mubr.msk.f32.mxu0 %vm286_vm1, %v22_v1  ;;  %3624 = vmatpush3.msk.msra.mxu0 %vm1055_vm0, %v278_v0  ;;  %v26_v5 = vld [vmem:[%s5573_s0 + $0x20] sm:$0xff]  ;;  %v28_v7 = vld [vmem:[%s5573_s0 + $0x30] sm:$0xff]  ;;  %v153_v9 = vld [vmem:[%s5573_s0 + $0x418] sm:$0xff]  ;;  %vm2984_vm9 = vcmask 1047559  }
   0x4   :  { %3626 = vmatmul.mubr.msk.f32.vlgmr.msra.gmra.mxu0 %vm286_vm1, %v23_v2  ;;  %4045 = vmatpush3.msk.msra.mxu1 %vm1055_vm0, %v278_v0  ;;  %v152_v8 = vld [vmem:[%s5573_s0 + $0x410] sm:$0xff]  ;;  %v154_v10 = vld [vmem:[%s5573_s0 + $0x420] sm:$0xff]  ;;  %v29_v11 = vld [vmem:[%s5573_s0 + $0x38] sm:$0xff] }
   0x5   :  { %3628 = vmatprep.mubr.msk.f32.mxu0 %vm286_vm1, %v24_v3  ;;  %3820 = vmatprep.mubr.msk.f32.mxu1 %vm286_vm1, %v152_v8  ;;  %v30_v12 = vld [vmem:[%s5573_s0 + $0x40] sm:$0xff]  ;;  %v155_v13 = vld [vmem:[%s5573_s0 + $0x428] sm:$0xff]  ;;  %v156_v14 = vld [vmem:[%s5573_s0 + $0x430] sm:$0xff] }
   0x6   :  { %3821 = vmatmul.mubr.msk.f32.vlgmr.msra.gmra.mxu1 %vm286_vm1, %v153_v9  ;;  %v31_v15 = vld [vmem:[%s5573_s0 + $0x48] sm:$0xff]  ;;  %v32_v16 = vld [vmem:[%s5573_s0 + $0x50] sm:$0xff]  ;;  %v157_v17 = vld [vmem:[%s5573_s0 + $0x438] sm:$0xff] }
   0x7   :  { %3823 = vmatprep.mubr.msk.f32.mxu1 %vm286_vm1, %v154_v10  ;;  %v158_v18 = vld [vmem:[%s5573_s0 + $0x440] sm:$0xff]  ;;  %v33_v19 = vld [vmem:[%s5573_s0 + $0x58] sm:$0xff]  ;;  %v159_v21 = vld [vmem:[%s5573_s0 + $0x448] sm:$0xff] }
   0x8   :  { %3629 = vmatmul.mubr.msk.f32.gmra.mxu0 %vm286_vm1, %v25_v4  ;;  %v34_v20 = vld [vmem:[%s5573_s0 + $0x60] sm:$0xff]  ;;  %v160_v22 = vld [vmem:[%s5573_s0 + $0x450] sm:$0xff]  ;;  %v35_v23 = vld [vmem:[%s5573_s0 + $0x68] sm:$0xff] }
   0x9   :  { %3631 = vmatprep.mubr.msk.f32.mxu0 %vm286_vm1, %v26_v5  ;;  %v36_v24 = vld [vmem:[%s5573_s0 + $0x70] sm:$0xff]  ;;  %v161_v25 = vld [vmem:[%s5573_s0 + $0x458] sm:$0xff]  ;;  %v162_v26 = vld [vmem:[%s5573_s0 + $0x460] sm:$0xff] }
   0xa   :  { %3824 = vmatmul.mubr.msk.f32.gmra.mxu1 %vm286_vm1, %v155_v13  ;;  %v37_v27 = vld [vmem:[%s5573_s0 + $0x78] sm:$0xff]  ;;  %v38_v28 = vld [vmem:[%s5573_s0 + $0x80] sm:$0xff]  ;;  %v163_v29 = vld [vmem:[%s5573_s0 + $0x468] sm:$0xff] }
   0xb   :  { %3826 = vmatprep.mubr.msk.f32.mxu1 %vm286_vm1, %v156_v14  ;;  %v164_v30 = vld [vmem:[%s5573_s0 + $0x470] sm:$0xff]  ;;  %v39_v31 = vld [vmem:[%s5573_s0 + $0x88] sm:$0xff]  ;;  %v165_v33 = vld [vmem:[%s5573_s0 + $0x478] sm:$0xff] }
   0xc   :  { %3632 = vmatmul.mubr.msk.f32.gmra.mxu0 %vm286_vm1, %v27_v6  ;;  %v40_v32 = vld [vmem:[%s5573_s0 + $0x90] sm:$0xff]  ;;  %v166_v34 = vld [vmem:[%s5573_s0 + $0x480] sm:$0xff]  ;;  %v41_v35 = vld [vmem:[%s5573_s0 + $0x98] sm:$0xff] }
   0xd   :  { %3634 = vmatprep.mubr.msk.f32.mxu0 %vm286_vm1, %v28_v7  ;;  %v42_v36 = vld [vmem:[%s5573_s0 + $0xa0] sm:$0xff]  ;;  %v167_v37 = vld [vmem:[%s5573_s0 + $0x488] sm:$0xff]  ;;  %v168_v38 = vld [vmem:[%s5573_s0 + $0x490] sm:$0xff] }
   0xe   :  { %3827 = vmatmul.mubr.msk.f32.gmra.mxu1 %vm286_vm1, %v157_v17  ;;  %v43_v39 = vld [vmem:[%s5573_s0 + $0xa8] sm:$0xff]  ;;  %v44_v40 = vld [vmem:[%s5573_s0 + $0xb0] sm:$0xff]  ;;  %v169_v41 = vld [vmem:[%s5573_s0 + $0x498] sm:$0xff] }
   0xf   :  { %3829 = vmatprep.mubr.msk.f32.mxu1 %vm286_vm1, %v158_v18  ;;  %v170_v42 = vld [vmem:[%s5573_s0 + $0x4a0] sm:$0xff]  ;;  %v45_v43 = vld [vmem:[%s5573_s0 + $0xb8] sm:$0xff]  ;;  %v171_v45 = vld [vmem:[%s5573_s0 + $0x4a8] sm:$0xff] }
  0x10   :  { %3635 = vmatmul.mubr.msk.f32.gmra.mxu0 %vm286_vm1, %v29_v11  ;;  %v46_v44 = vld [vmem:[%s5573_s0 + $0xc0] sm:$0xff]  ;;  %v172_v46 = vld [vmem:[%s5573_s0 + $0x4b0] sm:$0xff]  ;;  %v47_v47 = vld [vmem:[%s5573_s0 + $0xc8] sm:$0xff] }
  0x11   :  { %3637 = vmatprep.mubr.msk.f32.mxu0 %vm286_vm1, %v30_v12  ;;  %v48_v48 = vld [vmem:[%s5573_s0 + $0xd0] sm:$0xff]  ;;  %v173_v49 = vld [vmem:[%s5573_s0 + $0x4b8] sm:$0xff]  ;;  %v174_v50 = vld [vmem:[%s5573_s0 + $0x4c0] sm:$0xff] }
  0x12   :  { %3830 = vmatmul.mubr.msk.f32.gmra.mxu1 %vm286_vm1, %v159_v21  ;;  %v49_v51 = vld [vmem:[%s5573_s0 + $0xd8] sm:$0xff]  ;;  %v50_v52 = vld [vmem:[%s5573_s0 + $0xe0] sm:$0xff]  ;;  %v175_v53 = vld [vmem:[%s5573_s0 + $0x4c8] sm:$0xff] }
  0x13   :  { %3832 = vmatprep.mubr.msk.f32.mxu1 %vm286_vm1, %v160_v22  ;;  %v176_v54 = vld [vmem:[%s5573_s0 + $0x4d0] sm:$0xff]  ;;  %v51_v55 = vld [vmem:[%s5573_s0 + $0xe8] sm:$0xff]  ;;  %v177_v57 = vld [vmem:[%s5573_s0 + $0x4d8] sm:$0xff] }
  0x14   :  { %3638 = vmatmul.mubr.msk.f32.gmra.mxu0 %vm286_vm1, %v31_v15  ;;  %v52_v56 = vld [vmem:[%s5573_s0 + $0xf0] sm:$0xff]  ;;  %v178_v58 = vld [vmem:[%s5573_s0 + $0x4e0] sm:$0xff]  ;;  %v53_v59 = vld [vmem:[%s5573_s0 + $0xf8] sm:$0xff] }
  0x15   :  { %3640 = vmatprep.mubr.msk.f32.mxu0 %vm286_vm1, %v32_v16  ;;  %v54_v60 = vld [vmem:[%s5573_s0 + $0x100] sm:$0xff]  ;;  %v179_v61 = vld [vmem:[%s5573_s0 + $0x4e8] sm:$0xff]  ;;  %v180_v62 = vld [vmem:[%s5573_s0 + $0x4f0] sm:$0xff] }
  0x16   :  { %3833 = vmatmul.mubr.msk.f32.gmra.mxu1 %vm286_vm1, %v161_v25  ;;  %v55_v63 = vld [vmem:[%s5573_s0 + $0x108] sm:$0xff]  ;;  %v56_v0 = vld [vmem:[%s5573_s0 + $0x110] sm:$0xff]  ;;  %v181_v1 = vld [vmem:[%s5573_s0 + $0x4f8] sm:$0xff] }
  0x17   :  { %3835 = vmatprep.mubr.msk.f32.mxu1 %vm286_vm1, %v162_v26  ;;  %v182_v2 = vld [vmem:[%s5573_s0 + $0x500] sm:$0xff]  ;;  %v57_v3 = vld [vmem:[%s5573_s0 + $0x118] sm:$0xff]  ;;  %v183_v5 = vld [vmem:[%s5573_s0 + $0x508] sm:$0xff] }
  0x18   :  { %3641 = vmatmul.mubr.msk.f32.gmra.mxu0 %vm286_vm1, %v33_v19  ;;  %v58_v4 = vld [vmem:[%s5573_s0 + $0x120] sm:$0xff]  ;;  %v184_v6 = vld [vmem:[%s5573_s0 + $0x510] sm:$0xff]  ;;  %v59_v7 = vld [vmem:[%s5573_s0 + $0x128] sm:$0xff] }
  0x19   :  { %3643 = vmatprep.mubr.msk.f32.mxu0 %vm286_vm1, %v34_v20  ;;  %v60_v8 = vld [vmem:[%s5573_s0 + $0x130] sm:$0xff]  ;;  %v185_v9 = vld [vmem:[%s5573_s0 + $0x518] sm:$0xff]  ;;  %v186_v10 = vld [vmem:[%s5573_s0 + $0x520] sm:$0xff] }
  0x1a   :  { %3836 = vmatmul.mubr.msk.f32.gmra.mxu1 %vm286_vm1, %v163_v29  ;;  %v61_v11 = vld [vmem:[%s5573_s0 + $0x138] sm:$0xff]  ;;  %v62_v12 = vld [vmem:[%s5573_s0 + $0x140] sm:$0xff]  ;;  %v187_v13 = vld [vmem:[%s5573_s0 + $0x528] sm:$0xff] }
  0x1b   :  { %3838 = vmatprep.mubr.msk.f32.mxu1 %vm286_vm1, %v164_v30  ;;  %v188_v14 = vld [vmem:[%s5573_s0 + $0x530] sm:$0xff]  ;;  %v63_v15 = vld [vmem:[%s5573_s0 + $0x148] sm:$0xff]  ;;  %v189_v17 = vld [vmem:[%s5573_s0 + $0x538] sm:$0xff] }
  0x1c   :  { %3644 = vmatmul.mubr.msk.f32.gmra.mxu0 %vm286_vm1, %v35_v23  ;;  %v64_v16 = vld [vmem:[%s5573_s0 + $0x150] sm:$0xff]  ;;  %v190_v18 = vld [vmem:[%s5573_s0 + $0x540] sm:$0xff]  ;;  %v65_v19 = vld [vmem:[%s5573_s0 + $0x158] sm:$0xff] }
  0x1d   :  { %3646 = vmatprep.mubr.msk.f32.mxu0 %vm286_vm1, %v36_v24  ;;  %v66_v20 = vld [vmem:[%s5573_s0 + $0x160] sm:$0xff]  ;;  %v191_v21 = vld [vmem:[%s5573_s0 + $0x548] sm:$0xff]  ;;  %v192_v22 = vld [vmem:[%s5573_s0 + $0x550] sm:$0xff] }
  0x1e   :  { %3839 = vmatmul.mubr.msk.f32.gmra.mxu1 %vm286_vm1, %v165_v33  ;;  %v67_v23 = vld [vmem:[%s5573_s0 + $0x168] sm:$0xff]  ;;  %v68_v24 = vld [vmem:[%s5573_s0 + $0x170] sm:$0xff]  ;;  %v193_v25 = vld [vmem:[%s5573_s0 + $0x558] sm:$0xff] }
  0x1f   :  { %3841 = vmatprep.mubr.msk.f32.mxu1 %vm286_vm1, %v166_v34  ;;  %v194_v26 = vld [vmem:[%s5573_s0 + $0x560] sm:$0xff]  ;;  %v195_v29 = vld [vmem:[%s5573_s0 + $0x568] sm:$0xff]  ;;  %v196_v30 = vld [vmem:[%s5573_s0 + $0x570] sm:$0xff] }
  0x20   :  { %3647 = vmatmul.mubr.msk.f32.gmra.mxu0 %vm286_vm1, %v37_v27  ;;  %v69_v27 = vld [vmem:[%s5573_s0 + $0x178] sm:$0xff]  ;;  %v198_v34 = vld [vmem:[%s5573_s0 + $0x580] sm:$0xff] }
  0x21   :  { %3649 = vmatprep.mubr.msk.f32.mxu0 %vm286_vm1, %v38_v28  ;;  %v70_v28 = vld [vmem:[%s5573_s0 + $0x180] sm:$0xff]  ;;  %v197_v33 = vld [vmem:[%s5573_s0 + $0x578] sm:$0xff] }
  0x22   :  { %3842 = vmatmul.mubr.msk.f32.gmra.mxu1 %vm286_vm1, %v167_v37  ;;  %v199_v37 = vld [vmem:[%s5573_s0 + $0x588] sm:$0xff] }
  0x23   :  { %3844 = vmatprep.mubr.msk.f32.mxu1 %vm286_vm1, %v168_v38  ;;  %v200_v38 = vld [vmem:[%s5573_s0 + $0x590] sm:$0xff] }
  0x24   :  { %3650 = vmatmul.mubr.msk.f32.gmra.mxu0 %vm286_vm1, %v39_v31  ;;  %v71_v31 = vld [vmem:[%s5573_s0 + $0x188] sm:$0xff] }
  0x25   :  { %3652 = vmatprep.mubr.msk.f32.mxu0 %vm286_vm1, %v40_v32  ;;  %v72_v32 = vld [vmem:[%s5573_s0 + $0x190] sm:$0xff] }
  0x26   :  { %3845 = vmatmul.mubr.msk.f32.gmra.mxu1 %vm286_vm1, %v169_v41  ;;  %v201_v41 = vld [vmem:[%s5573_s0 + $0x598] sm:$0xff] }
  0x27   :  { %3847 = vmatprep.mubr.msk.f32.mxu1 %vm286_vm1, %v170_v42  ;;  %v202_v42 = vld [vmem:[%s5573_s0 + $0x5a0] sm:$0xff] }
  0x28   :  { %3653 = vmatmul.mubr.msk.f32.gmra.mxu0 %vm286_vm1, %v41_v35  ;;  %v73_v35 = vld [vmem:[%s5573_s0 + $0x198] sm:$0xff] }
  0x29   :  { %3655 = vmatprep.mubr.msk.f32.mxu0 %vm286_vm1, %v42_v36  ;;  %v74_v36 = vld [vmem:[%s5573_s0 + $0x1a0] sm:$0xff] }
  0x2a   :  { %3848 = vmatmul.mubr.msk.f32.gmra.mxu1 %vm286_vm1, %v171_v45  ;;  %v203_v45 = vld [vmem:[%s5573_s0 + $0x5a8] sm:$0xff] }
  0x2b   :  { %3850 = vmatprep.mubr.msk.f32.mxu1 %vm286_vm1, %v172_v46  ;;  %v204_v46 = vld [vmem:[%s5573_s0 + $0x5b0] sm:$0xff] }
  0x2c   :  { %3656 = vmatmul.mubr.msk.f32.gmra.mxu0 %vm286_vm1, %v43_v39  ;;  %v75_v39 = vld [vmem:[%s5573_s0 + $0x1a8] sm:$0xff] }
  0x2d   :  { %3658 = vmatprep.mubr.msk.f32.mxu0 %vm286_vm1, %v44_v40  ;;  %v76_v40 = vld [vmem:[%s5573_s0 + $0x1b0] sm:$0xff] }
  0x2e   :  { %3851 = vmatmul.mubr.msk.f32.gmra.mxu1 %vm286_vm1, %v173_v49  ;;  %v205_v49 = vld [vmem:[%s5573_s0 + $0x5b8] sm:$0xff] }
  0x2f   :  { %3853 = vmatprep.mubr.msk.f32.mxu1 %vm286_vm1, %v174_v50  ;;  %v206_v50 = vld [vmem:[%s5573_s0 + $0x5c0] sm:$0xff] }
  0x30   :  { %3659 = vmatmul.mubr.msk.f32.gmra.mxu0 %vm286_vm1, %v45_v43  ;;  %v77_v43 = vld [vmem:[%s5573_s0 + $0x1b8] sm:$0xff] }
  0x31   :  { %3661 = vmatprep.mubr.msk.f32.mxu0 %vm286_vm1, %v46_v44  ;;  %v78_v44 = vld [vmem:[%s5573_s0 + $0x1c0] sm:$0xff] }
  0x32   :  { %3854 = vmatmul.mubr.msk.f32.gmra.mxu1 %vm286_vm1, %v175_v53  ;;  %v207_v53 = vld [vmem:[%s5573_s0 + $0x5c8] sm:$0xff] }
  0x33   :  { %3856 = vmatprep.mubr.msk.f32.mxu1 %vm286_vm1, %v176_v54  ;;  %v208_v54 = vld [vmem:[%s5573_s0 + $0x5d0] sm:$0xff] }
  0x34   :  { %3662 = vmatmul.mubr.msk.f32.gmra.mxu0 %vm286_vm1, %v47_v47  ;;  %v79_v47 = vld [vmem:[%s5573_s0 + $0x1c8] sm:$0xff] }
  0x35   :  { %3664 = vmatprep.mubr.msk.f32.mxu0 %vm286_vm1, %v48_v48  ;;  %v80_v48 = vld [vmem:[%s5573_s0 + $0x1d0] sm:$0xff] }
  0x36   :  { %3857 = vmatmul.mubr.msk.f32.gmra.mxu1 %vm286_vm1, %v177_v57  ;;  %v209_v57 = vld [vmem:[%s5573_s0 + $0x5d8] sm:$0xff] }
  0x37   :  { %3859 = vmatprep.mubr.msk.f32.mxu1 %vm286_vm1, %v178_v58  ;;  %v210_v58 = vld [vmem:[%s5573_s0 + $0x5e0] sm:$0xff] }
  0x38   :  { %3665 = vmatmul.mubr.msk.f32.gmra.mxu0 %vm286_vm1, %v49_v51  ;;  %v81_v51 = vld [vmem:[%s5573_s0 + $0x1d8] sm:$0xff] }
  0x39   :  { %3667 = vmatprep.mubr.msk.f32.mxu0 %vm286_vm1, %v50_v52  ;;  %v82_v52 = vld [vmem:[%s5573_s0 + $0x1e0] sm:$0xff] }
  0x3a   :  { %3860 = vmatmul.mubr.msk.f32.gmra.mxu1 %vm286_vm1, %v179_v61  ;;  %v211_v61 = vld [vmem:[%s5573_s0 + $0x5e8] sm:$0xff] }
  0x3b   :  { %3862 = vmatprep.mubr.msk.f32.mxu1 %vm286_vm1, %v180_v62  ;;  %v212_v62 = vld [vmem:[%s5573_s0 + $0x5f0] sm:$0xff] }
  0x3c   :  { %3668 = vmatmul.mubr.msk.f32.gmra.mxu0 %vm286_vm1, %v51_v55  ;;  %v83_v55 = vld [vmem:[%s5573_s0 + $0x1e8] sm:$0xff] }
  0x3d   :  { %3670 = vmatprep.mubr.msk.f32.mxu0 %vm286_vm1, %v52_v56  ;;  %v84_v56 = vld [vmem:[%s5573_s0 + $0x1f0] sm:$0xff] }
  0x3e   :  { %3863 = vmatmul.mubr.msk.f32.gmra.mxu1 %vm286_vm1, %v181_v1  ;;  %v213_v1 = vld [vmem:[%s5573_s0 + $0x5f8] sm:$0xff] }
  0x3f   :  { %3865 = vmatprep.mubr.msk.f32.mxu1 %vm286_vm1, %v182_v2  ;;  %v214_v2 = vld [vmem:[%s5573_s0 + $0x600] sm:$0xff] }
  0x40   :  { %3671 = vmatmul.mubr.msk.f32.gmra.mxu0 %vm286_vm1, %v53_v59  ;;  %v85_v59 = vld [vmem:[%s5573_s0 + $0x1f8] sm:$0xff] }
  0x41   :  { %3673 = vmatprep.mubr.msk.f32.mxu0 %vm286_vm1, %v54_v60  ;;  %v86_v60 = vld [vmem:[%s5573_s0 + $0x200] sm:$0xff] }
  0x42   :  { %3866 = vmatmul.mubr.msk.f32.gmra.mxu1 %vm286_vm1, %v183_v5  ;;  %v215_v5 = vld [vmem:[%s5573_s0 + $0x608] sm:$0xff] }
  0x43   :  { %3868 = vmatprep.mubr.msk.f32.mxu1 %vm286_vm1, %v184_v6  ;;  %v216_v6 = vld [vmem:[%s5573_s0 + $0x610] sm:$0xff] }
  0x44   :  { %3674 = vmatmul.mubr.msk.f32.gmra.mxu0 %vm286_vm1, %v55_v63  ;;  %v87_v63 = vld [vmem:[%s5573_s0 + $0x208] sm:$0xff] }
  0x45   :  { %3676 = vmatprep.mubr.msk.f32.mxu0 %vm286_vm1, %v56_v0  ;;  %v88_v0 = vld [vmem:[%s5573_s0 + $0x210] sm:$0xff] }
  0x46   :  { %3869 = vmatmul.mubr.msk.f32.gmra.mxu1 %vm286_vm1, %v185_v9  ;;  %v217_v9 = vld [vmem:[%s5573_s0 + $0x618] sm:$0xff] }
  0x47   :  { %3871 = vmatprep.mubr.msk.f32.mxu1 %vm286_vm1, %v186_v10  ;;  %v218_v10 = vld [vmem:[%s5573_s0 + $0x620] sm:$0xff] }
  0x48   :  { %3677 = vmatmul.mubr.msk.f32.gmra.mxu0 %vm286_vm1, %v57_v3  ;;  %v89_v3 = vld [vmem:[%s5573_s0 + $0x218] sm:$0xff] }
  0x49   :  { %3679 = vmatprep.mubr.msk.f32.mxu0 %vm286_vm1, %v58_v4  ;;  %v90_v4 = vld [vmem:[%s5573_s0 + $0x220] sm:$0xff] }
  0x4a   :  { %3872 = vmatmul.mubr.msk.f32.gmra.mxu1 %vm286_vm1, %v187_v13  ;;  %v219_v13 = vld [vmem:[%s5573_s0 + $0x628] sm:$0xff] }
  0x4b   :  { %3874 = vmatprep.mubr.msk.f32.mxu1 %vm286_vm1, %v188_v14  ;;  %v220_v14 = vld [vmem:[%s5573_s0 + $0x630] sm:$0xff] }
  0x4c   :  { %3680 = vmatmul.mubr.msk.f32.gmra.mxu0 %vm286_vm1, %v59_v7  ;;  %v91_v7 = vld [vmem:[%s5573_s0 + $0x228] sm:$0xff] }
  0x4d   :  { %3682 = vmatprep.mubr.msk.f32.mxu0 %vm286_vm1, %v60_v8  ;;  %v92_v8 = vld [vmem:[%s5573_s0 + $0x230] sm:$0xff] }
  0x4e   :  { %3875 = vmatmul.mubr.msk.f32.gmra.mxu1 %vm286_vm1, %v189_v17  ;;  %v221_v17 = vld [vmem:[%s5573_s0 + $0x638] sm:$0xff] }
  0x4f   :  { %3877 = vmatprep.mubr.msk.f32.mxu1 %vm286_vm1, %v190_v18  ;;  %v222_v18 = vld [vmem:[%s5573_s0 + $0x640] sm:$0xff] }
  0x50   :  { %3683 = vmatmul.mubr.msk.f32.gmra.mxu0 %vm286_vm1, %v61_v11  ;;  %v93_v11 = vld [vmem:[%s5573_s0 + $0x238] sm:$0xff] }
  0x51   :  { %3685 = vmatprep.mubr.msk.f32.mxu0 %vm286_vm1, %v62_v12  ;;  %v94_v12 = vld [vmem:[%s5573_s0 + $0x240] sm:$0xff] }
  0x52   :  { %3878 = vmatmul.mubr.msk.f32.gmra.mxu1 %vm286_vm1, %v191_v21  ;;  %v223_v21 = vld [vmem:[%s5573_s0 + $0x648] sm:$0xff] }
  0x53   :  { %3880 = vmatprep.mubr.msk.f32.mxu1 %vm286_vm1, %v192_v22  ;;  %v224_v22 = vld [vmem:[%s5573_s0 + $0x650] sm:$0xff] }
  0x54   :  { %3686 = vmatmul.mubr.msk.f32.gmra.mxu0 %vm286_vm1, %v63_v15  ;;  %v95_v15 = vld [vmem:[%s5573_s0 + $0x248] sm:$0xff] }
  0x55   :  { %3688 = vmatprep.mubr.msk.f32.mxu0 %vm286_vm1, %v64_v16  ;;  %v96_v16 = vld [vmem:[%s5573_s0 + $0x250] sm:$0xff] }
  0x56   :  { %3881 = vmatmul.mubr.msk.f32.gmra.mxu1 %vm286_vm1, %v193_v25  ;;  %v225_v25 = vld [vmem:[%s5573_s0 + $0x658] sm:$0xff] }
  0x57   :  { %3883 = vmatprep.mubr.msk.f32.mxu1 %vm286_vm1, %v194_v26  ;;  %v226_v26 = vld [vmem:[%s5573_s0 + $0x660] sm:$0xff] }
  0x58   :  { %3689 = vmatmul.mubr.msk.f32.gmra.mxu0 %vm286_vm1, %v65_v19  ;;  %v97_v19 = vld [vmem:[%s5573_s0 + $0x258] sm:$0xff] }
  0x59   :  { %3691 = vmatprep.mubr.msk.f32.mxu0 %vm286_vm1, %v66_v20  ;;  %v98_v20 = vld [vmem:[%s5573_s0 + $0x260] sm:$0xff] }
  0x5a   :  { %3884 = vmatmul.mubr.msk.f32.gmra.mxu1 %vm286_vm1, %v195_v29  ;;  %v227_v29 = vld [vmem:[%s5573_s0 + $0x668] sm:$0xff] }
  0x5b   :  { %3886 = vmatprep.mubr.msk.f32.mxu1 %vm286_vm1, %v196_v30  ;;  %v228_v30 = vld [vmem:[%s5573_s0 + $0x670] sm:$0xff] }
  0x5c   :  { %3692 = vmatmul.mubr.msk.f32.gmra.mxu0 %vm286_vm1, %v67_v23  ;;  %v99_v23 = vld [vmem:[%s5573_s0 + $0x268] sm:$0xff] }
  0x5d   :  { %3694 = vmatprep.mubr.msk.f32.mxu0 %vm286_vm1, %v68_v24  ;;  %v100_v24 = vld [vmem:[%s5573_s0 + $0x270] sm:$0xff] }
  0x5e   :  { %3887 = vmatmul.mubr.msk.f32.gmra.mxu1 %vm286_vm1, %v197_v33  ;;  %v229_v33 = vld [vmem:[%s5573_s0 + $0x678] sm:$0xff] }
  0x5f   :  { %3889 = vmatprep.mubr.msk.f32.mxu1 %vm286_vm1, %v198_v34  ;;  %v230_v34 = vld [vmem:[%s5573_s0 + $0x680] sm:$0xff] }
  0x60   :  { %3695 = vmatmul.mubr.msk.f32.gmra.mxu0 %vm286_vm1, %v69_v27  ;;  %v101_v27 = vld [vmem:[%s5573_s0 + $0x278] sm:$0xff] }
  0x61   :  { %3697 = vmatprep.mubr.msk.f32.mxu0 %vm286_vm1, %v70_v28  ;;  %v102_v28 = vld [vmem:[%s5573_s0 + $0x280] sm:$0xff] }
  0x62   :  { %3890 = vmatmul.mubr.msk.f32.gmra.mxu1 %vm286_vm1, %v199_v37  ;;  %v105_v37 = vld [vmem:[%s5573_s0 + $0x298] sm:$0xff] }
  0x63   :  { %3892 = vmatprep.mubr.msk.f32.mxu1 %vm286_vm1, %v200_v38  ;;  %v106_v38 = vld [vmem:[%s5573_s0 + $0x2a0] sm:$0xff] }
  0x64   :  { %3698 = vmatmul.mubr.msk.f32.gmra.mxu0 %vm286_vm1, %v71_v31  ;;  %v103_v31 = vld [vmem:[%s5573_s0 + $0x288] sm:$0xff] }
  0x65   :  { %3700 = vmatprep.mubr.msk.f32.mxu0 %vm286_vm1, %v72_v32  ;;  %v104_v32 = vld [vmem:[%s5573_s0 + $0x290] sm:$0xff] }
  0x66   :  { %3893 = vmatmul.mubr.msk.f32.gmra.mxu1 %vm286_vm1, %v201_v41  ;;  %v107_v41 = vld [vmem:[%s5573_s0 + $0x2a8] sm:$0xff] }
  0x67   :  { %3895 = vmatprep.mubr.msk.f32.mxu1 %vm286_vm1, %v202_v42  ;;  %v108_v42 = vld [vmem:[%s5573_s0 + $0x2b0] sm:$0xff] }
  0x68   :  { %3701 = vmatmul.mubr.msk.f32.gmra.mxu0 %vm286_vm1, %v73_v35  ;;  %v4050_v35 = vmov 0.0  }
  0x69   :  { %3703 = vmatprep.mubr.msk.f32.mxu0 %vm286_vm1, %v74_v36  ;;  %4009 = vmatprep.subr.mxu1 %v4050_v35  ;;  %v3003_v36 = vld [vmem:[%s5574_s3 + $0x78] sm:$0xff] }
  0x6a   :  { %3896 = vmatmul.mubr.msk.f32.gmra.mxu1 %vm286_vm1, %v203_v45  ;;  %v109_v45 = vld [vmem:[%s5573_s0 + $0x2b8] sm:$0xff] }
  0x6b   :  { %3898 = vmatprep.mubr.msk.f32.mxu1 %vm286_vm1, %v204_v46  ;;  %4010 = vmatpush3.msra.mxu1 %v3003_v36  ;;  %v110_v46 = vld [vmem:[%s5573_s0 + $0x2c0] sm:$0xff] }
  0x6c   :  { %3704 = vmatmul.mubr.msk.f32.gmra.mxu0 %vm286_vm1, %v75_v39  ;;  %v231_v39 = vld [vmem:[%s5573_s0 + $0x688] sm:$0xff]  ;;  %4011 = vmatprep.subr.mxu1 %v4050_v35 }
  0x6d   :  { %3706 = vmatprep.mubr.msk.f32.mxu0 %vm286_vm1, %v76_v40  ;;  %v232_v40 = vld [vmem:[%s5573_s0 + $0x690] sm:$0xff] }
  0x6e   :  { %3899 = vmatmul.mubr.msk.f32.gmra.mxu1 %vm286_vm1, %v205_v49  ;;  %v111_v49 = vld [vmem:[%s5573_s0 + $0x2c8] sm:$0xff] }
  0x6f   :  { %3901 = vmatprep.mubr.msk.f32.mxu1 %vm286_vm1, %v206_v50  ;;  %v112_v50 = vld [vmem:[%s5573_s0 + $0x2d0] sm:$0xff] }
  0x70   :  { %3707 = vmatmul.mubr.msk.f32.gmra.mxu0 %vm286_vm1, %v77_v43  ;;  %v233_v43 = vld [vmem:[%s5573_s0 + $0x698] sm:$0xff] }
  0x71   :  { %3709 = vmatprep.mubr.msk.f32.mxu0 %vm286_vm1, %v78_v44  ;;  %v234_v44 = vld [vmem:[%s5573_s0 + $0x6a0] sm:$0xff] }
  0x72   :  { %3902 = vmatmul.mubr.msk.f32.gmra.mxu1 %vm286_vm1, %v207_v53  ;;  %v3002_v53 = vld [vmem:[%s5574_s3 + $0x70] sm:$0xff] }
  0x73   :  { %3904 = vmatprep.mubr.msk.f32.mxu1 %vm286_vm1, %v208_v54  ;;  %4012 = vmatpush3.msra.mxu1 %v3002_v53  ;;  %v113_v54 = vld [vmem:[%s5573_s0 + $0x2d8] sm:$0xff] }
  0x74   :  { %3710 = vmatmul.mubr.msk.f32.gmra.mxu0 %vm286_vm1, %v79_v47  ;;  %v235_v47 = vld [vmem:[%s5573_s0 + $0x6a8] sm:$0xff]  ;;  %4013 = vmatprep.subr.mxu1 %v4050_v35 }
  0x75   :  { %3712 = vmatprep.mubr.msk.f32.mxu0 %vm286_vm1, %v80_v48  ;;  %v236_v48 = vld [vmem:[%s5573_s0 + $0x6b0] sm:$0xff] }
  0x76   :  { %3905 = vmatmul.mubr.msk.f32.gmra.mxu1 %vm286_vm1, %v209_v57  ;;  %v240_v57 = vld [vmem:[%s5573_s0 + $0x6d0] sm:$0xff] }
  0x77   :  { %3907 = vmatprep.mubr.msk.f32.mxu1 %vm286_vm1, %v210_v58  ;;  %v115_v58 = vld [vmem:[%s5573_s0 + $0x2e8] sm:$0xff] }
  0x78   :  { %3713 = vmatmul.mubr.msk.f32.gmra.mxu0 %vm286_vm1, %v81_v51  ;;  %v237_v51 = vld [vmem:[%s5573_s0 + $0x6b8] sm:$0xff] }
  0x79   :  { %3715 = vmatprep.mubr.msk.f32.mxu0 %vm286_vm1, %v82_v52  ;;  %v238_v52 = vld [vmem:[%s5573_s0 + $0x6c0] sm:$0xff] }
  0x7a   :  { %3908 = vmatmul.mubr.msk.f32.gmra.mxu1 %vm286_vm1, %v211_v61  ;;  %v242_v61 = vld [vmem:[%s5573_s0 + $0x6e0] sm:$0xff] }
  0x7b   :  { %3910 = vmatprep.mubr.msk.f32.mxu1 %vm286_vm1, %v212_v62  ;;  %v117_v62 = vld [vmem:[%s5573_s0 + $0x2f8] sm:$0xff] }
  0x7c   :  { %3716 = vmatmul.mubr.msk.f32.gmra.mxu0 %vm286_vm1, %v83_v55  ;;  %v114_v55 = vld [vmem:[%s5573_s0 + $0x2e0] sm:$0xff] }
  0x7d   :  { %3718 = vmatprep.mubr.msk.f32.mxu0 %vm286_vm1, %v84_v56  ;;  %v239_v56 = vld [vmem:[%s5573_s0 + $0x6c8] sm:$0xff] }
  0x7e   :  { %3911 = vmatmul.mubr.msk.f32.gmra.mxu1 %vm286_vm1, %v213_v1  ;;  %v244_v1 = vld [vmem:[%s5573_s0 + $0x6f0] sm:$0xff] }
  0x7f   :  { %3913 = vmatprep.mubr.msk.f32.mxu1 %vm286_vm1, %v214_v2  ;;  %v119_v2 = vld [vmem:[%s5573_s0 + $0x308] sm:$0xff] }
  0x80   :  { %3719 = vmatmul.mubr.msk.f32.gmra.mxu0 %vm286_vm1, %v85_v59  ;;  %v116_v59 = vld [vmem:[%s5573_s0 + $0x2f0] sm:$0xff] }
  0x81   :  { %3721 = vmatprep.mubr.msk.f32.mxu0 %vm286_vm1, %v86_v60  ;;  %v241_v60 = vld [vmem:[%s5573_s0 + $0x6d8] sm:$0xff] }
  0x82   :  { %3914 = vmatmul.mubr.msk.f32.gmra.mxu1 %vm286_vm1, %v215_v5  ;;  %v245_v5 = vld [vmem:[%s5573_s0 + $0x6f8] sm:$0xff] }
  0x83   :  { %3916 = vmatprep.mubr.msk.f32.mxu1 %vm286_vm1, %v216_v6  ;;  %v246_v6 = vld [vmem:[%s5573_s0 + $0x700] sm:$0xff] }
  0x84   :  { %3722 = vmatmul.mubr.msk.f32.gmra.mxu0 %vm286_vm1, %v87_v63  ;;  %v118_v63 = vld [vmem:[%s5573_s0 + $0x300] sm:$0xff] }
  0x85   :  { %3724 = vmatprep.mubr.msk.f32.mxu0 %vm286_vm1, %v88_v0  ;;  %v243_v0 = vld [vmem:[%s5573_s0 + $0x6e8] sm:$0xff] }
  0x86   :  { %3917 = vmatmul.mubr.msk.f32.gmra.mxu1 %vm286_vm1, %v217_v9 }
  0x87   :  { %3919 = vmatprep.mubr.msk.f32.mxu1 %vm286_vm1, %v218_v10  ;;  %v121_v10 = vld [vmem:[%s5573_s0 + $0x318] sm:$0xff] }
  0x88   :  { %3725 = vmatmul.mubr.msk.f32.gmra.mxu0 %vm286_vm1, %v89_v3  ;;  %v4864_v3 = vld [vmem:[%s5575_s2] ss:$0 sm:$0xff] }
  0x89   :  { %3727 = vmatprep.mubr.msk.f32.mxu0 %vm286_vm1, %v90_v4  ;;  %v120_v4 = vld [vmem:[%s5573_s0 + $0x310] sm:$0xff] }
  0x8a   :  { %3920 = vmatmul.mubr.msk.f32.gmra.mxu1 %vm286_vm1, %v219_v13  ;;  %v247_v13 = vld [vmem:[%s5573_s0 + $0x708] sm:$0xff] }
  0x8b   :  { %3922 = vmatprep.mubr.msk.f32.mxu1 %vm286_vm1, %v220_v14 }
  0x8c   :  { %3728 = vmatmul.mubr.msk.f32.gmra.mxu0 %vm286_vm1, %v91_v7  ;;  %v3001_v7 = vld [vmem:[%s5574_s3 + $0x68] sm:$0xff] }
  0x8d   :  { %3730 = vmatprep.mubr.msk.f32.mxu0 %vm286_vm1, %v92_v8  ;;  %4014 = vmatpush3.msra.mxu1 %v3001_v7 }
  0x8e   :  { %3923 = vmatmul.mubr.msk.f32.gmra.mxu1 %vm286_vm1, %v221_v17  ;;  %4015 = vmatprep.subr.mxu1 %v4050_v35 }
  0x8f   :  { %3925 = vmatprep.mubr.msk.f32.mxu1 %vm286_vm1, %v222_v18 }
  0x90   :  { %3731 = vmatmul.mubr.msk.f32.gmra.mxu0 %vm286_vm1, %v93_v11 }
  0x91   :  { %3733 = vmatprep.mubr.msk.f32.mxu0 %vm286_vm1, %v94_v12  ;;  %v122_v12 = vld [vmem:[%s5573_s0 + $0x320] sm:$0xff] }
  0x92   :  { %3926 = vmatmul.mubr.msk.f32.gmra.mxu1 %vm286_vm1, %v223_v21  ;;  %v124_v21 = vld [vmem:[%s5573_s0 + $0x330] sm:$0xff] }
  0x93   :  { %3928 = vmatprep.mubr.msk.f32.mxu1 %vm286_vm1, %v224_v22  ;;  %v249_v22 = vld [vmem:[%s5573_s0 + $0x718] sm:$0xff] }
  0x94   :  { %3734 = vmatmul.mubr.msk.f32.gmra.mxu0 %vm286_vm1, %v95_v15  ;;  %v248_v15 = vld [vmem:[%s5573_s0 + $0x710] sm:$0xff] }
  0x95   :  { %3736 = vmatprep.mubr.msk.f32.mxu0 %vm286_vm1, %v96_v16 }
  0x96   :  { %3929 = vmatmul.mubr.msk.f32.gmra.mxu1 %vm286_vm1, %v225_v25 }
  0x97   :  { %3931 = vmatprep.mubr.msk.f32.mxu1 %vm286_vm1, %v226_v26  ;;  %v250_v26 = vld [vmem:[%s5573_s0 + $0x720] sm:$0xff] }
  0x98   :  { %3737 = vmatmul.mubr.msk.f32.gmra.mxu0 %vm286_vm1, %v97_v19  ;;  %v123_v19 = vld [vmem:[%s5573_s0 + $0x328] sm:$0xff] }
  0x99   :  { %3739 = vmatprep.mubr.msk.f32.mxu0 %vm286_vm1, %v98_v20 }
  0x9a   :  { %3932 = vmatmul.mubr.msk.f32.gmra.mxu1 %vm286_vm1, %v227_v29  ;;  %v125_v29 = vld [vmem:[%s5573_s0 + $0x338] sm:$0xff] }
  0x9b   :  { %3934 = vmatprep.mubr.msk.f32.mxu1 %vm286_vm1, %v228_v30 }
  0x9c   :  { %3740 = vmatmul.mubr.msk.f32.gmra.mxu0 %vm286_vm1, %v99_v23 }
  0x9d   :  { %3742 = vmatprep.mubr.msk.f32.mxu0 %vm286_vm1, %v100_v24 }
  0x9e   :  { %3935 = vmatmul.mubr.msk.f32.gmra.mxu1 %vm286_vm1, %v229_v33  ;;  %v251_v33 = vld [vmem:[%s5573_s0 + $0x728] sm:$0xff] }
  0x9f   :  { %3937 = vmatprep.mubr.msk.f32.mxu1 %vm286_vm1, %v230_v34 }
  0xa0   :  { %3743 = vmatmul.mubr.msk.f32.gmra.mxu0 %vm286_vm1, %v101_v27 }
  0xa1   :  { %3745 = vmatprep.mubr.msk.f32.mxu0 %vm286_vm1, %v102_v28 }
  0xa2   :  { %3938 = vmatmul.mubr.msk.f32.gmra.mxu1 %vm286_vm1, %v231_v39 }
  0xa3   :  { %3940 = vmatprep.mubr.msk.f32.mxu1 %vm286_vm1, %v232_v40  ;;  %v252_v40 = vld [vmem:[%s5573_s0 + $0x730] sm:$0xff] }
  0xa4   :  { %3746 = vmatmul.mubr.msk.f32.gmra.mxu0 %vm286_vm1, %v103_v31 }
  0xa5   :  { %3748 = vmatprep.mubr.msk.f32.mxu0 %vm286_vm1, %v104_v32  ;;  %v126_v32 = vld [vmem:[%s5573_s0 + $0x340] sm:$0xff] }
  0xa6   :  { %3941 = vmatmul.mubr.msk.f32.gmra.mxu1 %vm286_vm1, %v233_v43 }
  0xa7   :  { %3943 = vmatprep.mubr.msk.f32.mxu1 %vm286_vm1, %v234_v44  ;;  %v127_v44 = vld [vmem:[%s5573_s0 + $0x348] sm:$0xff] }
  0xa8   :  { %3749 = vmatmul.mubr.msk.f32.gmra.mxu0 %vm286_vm1, %v105_v37 }
  0xa9   :  { %3751 = vmatprep.mubr.msk.f32.mxu0 %vm286_vm1, %v106_v38 }
  0xaa   :  { %3944 = vmatmul.mubr.msk.f32.gmra.mxu1 %vm286_vm1, %v235_v47  ;;  %v128_v47 = vld [vmem:[%s5573_s0 + $0x350] sm:$0xff] }
  0xab   :  { %3946 = vmatprep.mubr.msk.f32.mxu1 %vm286_vm1, %v236_v48  ;;  %v253_v48 = vld [vmem:[%s5573_s0 + $0x738] sm:$0xff] }
  0xac   :  { %3752 = vmatmul.mubr.msk.f32.gmra.mxu0 %vm286_vm1, %v107_v41 }
  0xad   :  { %3754 = vmatprep.mubr.msk.f32.mxu0 %vm286_vm1, %v108_v42 }
  0xae   :  { %3947 = vmatmul.mubr.msk.f32.gmra.mxu1 %vm286_vm1, %v237_v51 }
  0xaf   :  { %3949 = vmatprep.mubr.msk.f32.mxu1 %vm286_vm1, %v238_v52 }
  0xb0   :  { %3755 = vmatmul.mubr.msk.f32.gmra.mxu0 %vm286_vm1, %v109_v45 }
  0xb1   :  { %3757 = vmatprep.mubr.msk.f32.mxu0 %vm286_vm1, %v110_v46 }
  0xb2   :  { %3950 = vmatmul.mubr.msk.f32.gmra.mxu1 %vm286_vm1, %v239_v56 }
  0xb3   :  { %3952 = vmatprep.mubr.msk.f32.mxu1 %vm286_vm1, %v240_v57 }
  0xb4   :  { %3758 = vmatmul.mubr.msk.f32.gmra.mxu0 %vm286_vm1, %v111_v49 }
  0xb5   :  { %3760 = vmatprep.mubr.msk.f32.mxu0 %vm286_vm1, %v112_v50 }
  0xb6   :  { %3953 = vmatmul.mubr.msk.f32.gmra.mxu1 %vm286_vm1, %v241_v60 }
  0xb7   :  { %3955 = vmatprep.mubr.msk.f32.mxu1 %vm286_vm1, %v242_v61  ;;  %v130_v61 = vld [vmem:[%s5573_s0 + $0x360] sm:$0xff] }
  0xb8   :  { %3761 = vmatmul.mubr.msk.f32.gmra.mxu0 %vm286_vm1, %v113_v54  ;;  %v254_v54 = vld [vmem:[%s5573_s0 + $0x740] sm:$0xff] }
  0xb9   :  { %3763 = vmatprep.mubr.msk.f32.mxu0 %vm286_vm1, %v114_v55 }
  0xba   :  { %3956 = vmatmul.mubr.msk.f32.gmra.mxu1 %vm286_vm1, %v243_v0 }
  0xbb   :  { %3958 = vmatprep.mubr.msk.f32.mxu1 %vm286_vm1, %v244_v1 }
  0xbc   :  { %3764 = vmatmul.mubr.msk.f32.gmra.mxu0 %vm286_vm1, %v115_v58  ;;  %v129_v58 = vld [vmem:[%s5573_s0 + $0x358] sm:$0xff] }
  0xbd   :  { %3766 = vmatprep.mubr.msk.f32.mxu0 %vm286_vm1, %v116_v59 }
  0xbe   :  { %3959 = vmatmul.mubr.msk.f32.gmra.mxu1 %vm286_vm1, %v245_v5  ;;  %v256_v5 = vld [vmem:[%s5573_s0 + $0x750] sm:$0xff] }
  0xbf   :  { %3961 = vmatprep.mubr.msk.f32.mxu1 %vm286_vm1, %v246_v6 }
  0xc0   :  { %3767 = vmatmul.mubr.msk.f32.gmra.mxu0 %vm286_vm1, %v117_v62  ;;  %v255_v62 = vld [vmem:[%s5573_s0 + $0x748] sm:$0xff] }
  0xc1   :  { %3769 = vmatprep.mubr.msk.f32.mxu0 %vm286_vm1, %v118_v63 }
  0xc2   :  { %3962 = vmatmul.mubr.msk.f32.gmra.mxu1 %vm286_vm1, %v247_v13  ;;  %v132_v13 = vld [vmem:[%s5573_s0 + $0x370] sm:$0xff] }
  0xc3   :  { %3964 = vmatprep.mubr.msk.f32.mxu1 %vm286_vm1, %v248_v15 }
  0xc4   :  { %v3627_v8 = vpop.f32.mrf.mxu0  ;;  %3770 = vmatmul.mubr.msk.f32.gmra.mxu0 %vm286_vm1, %v119_v2 }
  0xc5   :  { %v1131_v9 = vadd.f32 %v3627_v8, %v4864_v3  ;;  %3772 = vmatprep.mubr.msk.f32.mxu0 %vm286_vm1, %v120_v4 }
  0xc6   :  { %v1125_v11 = vpop.f32.mrf.mxu0  ;;  %v4921_v30 = vpop.f32.mrf.mxu1  ;;  %3965 = vmatmul.mubr.msk.f32.gmra.mxu1 %vm286_vm1, %v249_v22 }
  0xc7   :  { %v1126_v14 = vadd.f32 %v4864_v3, %v1125_v11  ;;  %v2405_v17 = vmax.f32 %v1131_v9, 0.0  ;;  %3967 = vmatprep.mubr.msk.f32.mxu1 %vm286_vm1, %v250_v26  ;;  %v131_v9 = vld [vmem:[%s5573_s0 + $0x368] sm:$0xff]  ;;  %v3000_v11 = vld [vmem:[%s5574_s3 + $0x60] sm:$0xff] }
  0xc8   :  { %v3630_v16 = vpop.f32.mrf.mxu0  ;;  %3773 = vmatmul.mubr.msk.f32.gmra.mxu0 %vm286_vm1, %v121_v10  ;;  %v4933_v39 = vpop.f32.mrf.mxu1  ;;  %4016 = vmatpush3.msra.mxu1 %v3000_v11 }
  0xc9   :  { %v2404_v18 = vmax.f32 %v1126_v14, 0.0  ;;  %3775 = vmatprep.mubr.msk.f32.mxu0 %vm286_vm1, %v122_v12  ;;  %v1141_v24 = vadd.f32 %v3630_v16, %v4864_v3  ;;  %v257_v14 = vld [vmem:[%s5573_s0 + $0x758] sm:$0xff]  ;;  %4017 = vmatprep.subr.mxu1 %v4050_v35 }
  0xca   :  { %v1135_v20 = vpop.f32.mrf.mxu0  ;;  %v4943_v45 = vpop.f32.mrf.mxu1  ;;  %3968 = vmatmul.mubr.msk.f32.gmra.mxu1 %vm286_vm1, %v251_v33 }
  0xcb   :  { %v2660_v23 = vadd.f32 %v2405_v17, %v2404_v18  ;;  %v1136_v25 = vadd.f32 %v4864_v3, %v1135_v20  ;;  %v2407_v34 = vmax.f32 %v1141_v24, 0.0  ;;  %3970 = vmatprep.mubr.msk.f32.mxu1 %vm286_vm1, %v252_v40  ;;  %v258_v20 = vld [vmem:[%s5573_s0 + $0x760] sm:$0xff]  ;;  %v133_v24 = vld [vmem:[%s5573_s0 + $0x378] sm:$0xff] }
  0xcc   :  { %v3633_v27 = vpop.f32.mrf.mxu0  ;;  %3776 = vmatmul.mubr.msk.f32.gmra.mxu0 %vm286_vm1, %v123_v19  ;;  %v4955_v53 = vpop.f32.mrf.mxu1 }
  0xcd   :  { %v2406_v28 = vmax.f32 %v1136_v25, 0.0  ;;  %3778 = vmatprep.mubr.msk.f32.mxu0 %vm286_vm1, %v124_v21  ;;  %v1151_v37 = vadd.f32 %v3633_v27, %v4864_v3  ;;  %v134_v27 = vld [vmem:[%s5573_s0 + $0x380] sm:$0xff] }
  0xce   :  { %v1145_v31 = vpop.f32.mrf.mxu0  ;;  %v4965_v59 = vpop.f32.mrf.mxu1  ;;  %3971 = vmatmul.mubr.msk.f32.gmra.mxu1 %vm286_vm1, %v253_v48 }
  0xcf   :  { %v2661_v36 = vadd.f32 %v2660_v23, %v2406_v28  ;;  %v1146_v38 = vadd.f32 %v4864_v3, %v1145_v31  ;;  %v2409_v49 = vmax.f32 %v1151_v37, 0.0  ;;  %3973 = vmatprep.mubr.msk.f32.mxu1 %vm286_vm1, %v254_v54  ;;  %v259_v28 = vld [vmem:[%s5573_s0 + $0x768] sm:$0xff]  ;;  %v2999_v54 = vld [vmem:[%s5574_s3 + $0x58] sm:$0xff] }
  0xd0   :  { %v3636_v41 = vpop.f32.mrf.mxu0  ;;  %3779 = vmatmul.mubr.msk.f32.gmra.mxu0 %vm286_vm1, %v125_v29  ;;  %v4977_v4 = vpop.f32.mrf.mxu1  ;;  %4018 = vmatpush3.msra.mxu1 %v2999_v54  ;;  %v269_v54 = vld [vmem:[%s5573_s0 + $0x7b8] sm:$0xff] }
  0xd1   :  { %v2408_v42 = vmax.f32 %v1146_v38, 0.0  ;;  %v2662_v43 = vadd.f32 %v2661_v36, %v2407_v34  ;;  %3781 = vmatprep.mubr.msk.f32.mxu0 %vm286_vm1, %v126_v32  ;;  %v1161_v51 = vadd.f32 %v3636_v41, %v4864_v3  ;;  %v260_v36 = vld [vmem:[%s5573_s0 + $0x770] sm:$0xff]  ;;  %v135_v41 = vld [vmem:[%s5573_s0 + $0x388] sm:$0xff]  ;;  %4019 = vmatprep.subr.mxu1 %v4050_v35 }
  0xd2   :  { %v1155_v46 = vpop.f32.mrf.mxu0  ;;  %v4987_v10 = vpop.f32.mrf.mxu1  ;;  %3974 = vmatmul.mubr.msk.f32.gmra.mxu1 %vm286_vm1, %v255_v62  ;;  %v138_v62 = vld [vmem:[%s5573_s0 + $0x3a0] sm:$0xff] }
  0xd3   :  { %v2663_v50 = vadd.f32 %v2662_v43, %v2408_v42  ;;  %v1156_v52 = vadd.f32 %v4864_v3, %v1155_v46  ;;  %v2411_v63 = vmax.f32 %v1161_v51, 0.0  ;;  %3976 = vmatprep.mubr.msk.f32.mxu1 %vm286_vm1, %v256_v5  ;;  %v261_v46 = vld [vmem:[%s5573_s0 + $0x778] sm:$0xff] }
  0xd4   :  { %v3639_v55 = vpop.f32.mrf.mxu0  ;;  %3782 = vmatmul.mubr.msk.f32.gmra.mxu0 %vm286_vm1, %v127_v44  ;;  %v5002_v19 = vpop.f32.mrf.mxu1  ;;  %v136_v44 = vld [vmem:[%s5573_s0 + $0x390] sm:$0xff] }
  0xd5   :  { %v2410_v56 = vmax.f32 %v1156_v52, 0.0  ;;  %v2664_v57 = vadd.f32 %v2663_v50, %v2409_v49  ;;  %3784 = vmatprep.mubr.msk.f32.mxu0 %vm286_vm1, %v128_v47  ;;  %v1171_v1 = vadd.f32 %v3639_v55, %v4864_v3  ;;  %v262_v52 = vld [vmem:[%s5573_s0 + $0x780] sm:$0xff] }
  0xd6   :  { %v1165_v60 = vpop.f32.mrf.mxu0  ;;  %v5013_v25 = vpop.f32.mrf.mxu1  ;;  %3977 = vmatmul.mubr.msk.f32.gmra.mxu1 %vm286_vm1, %v257_v14 }
  0xd7   :  { %v2665_v0 = vadd.f32 %v2664_v57, %v2410_v56  ;;  %v1166_v2 = vadd.f32 %v4864_v3, %v1165_v60  ;;  %v2413_v15 = vmax.f32 %v1171_v1, 0.0  ;;  %3979 = vmatprep.mubr.msk.f32.mxu1 %vm286_vm1, %v258_v20 }
  0xd8   :  { %v3642_v6 = vpop.f32.mrf.mxu0  ;;  %3785 = vmatmul.mubr.msk.f32.gmra.mxu0 %vm286_vm1, %v129_v58  ;;  %v5025_v34 = vpop.f32.mrf.mxu1  ;;  %v137_v58 = vld [vmem:[%s5573_s0 + $0x398] sm:$0xff] }
  0xd9   :  { %v2412_v7 = vmax.f32 %v1166_v2, 0.0  ;;  %v2666_v8 = vadd.f32 %v2665_v0, %v2411_v63  ;;  %3787 = vmatprep.mubr.msk.f32.mxu0 %vm286_vm1, %v130_v61  ;;  %v1181_v17 = vadd.f32 %v3642_v6, %v4864_v3  ;;  %v263_v63 = vld [vmem:[%s5573_s0 + $0x788] sm:$0xff] }
  0xda   :  { %v1175_v12 = vpop.f32.mrf.mxu0  ;;  %v5035_v42 = vpop.f32.mrf.mxu1  ;;  %3980 = vmatmul.mubr.msk.f32.gmra.mxu1 %vm286_vm1, %v259_v28  ;;  %v141_v28 = vld [vmem:[%s5573_s0 + $0x3b8] sm:$0xff] }
  0xdb   :  { %v2667_v16 = vadd.f32 %v2666_v8, %v2412_v7  ;;  %v1176_v18 = vadd.f32 %v4864_v3, %v1175_v12  ;;  %v2415_v29 = vmax.f32 %v1181_v17, 0.0  ;;  %3982 = vmatprep.mubr.msk.f32.mxu1 %vm286_vm1, %v260_v36  ;;  %v264_v7 = vld [vmem:[%s5573_s0 + $0x790] sm:$0xff]  ;;  %v139_v12 = vld [vmem:[%s5573_s0 + $0x3a8] sm:$0xff] }
  0xdc   :  { %v3645_v21 = vpop.f32.mrf.mxu0  ;;  %3788 = vmatmul.mubr.msk.f32.gmra.mxu0 %vm286_vm1, %v131_v9  ;;  %v5047_v51 = vpop.f32.mrf.mxu1 }
  0xdd   :  { %v2414_v22 = vmax.f32 %v1176_v18, 0.0  ;;  %v2668_v23 = vadd.f32 %v2667_v16, %v2413_v15  ;;  %3790 = vmatprep.mubr.msk.f32.mxu0 %vm286_vm1, %v132_v13  ;;  %v1191_v32 = vadd.f32 %v3645_v21, %v4864_v3  ;;  %v140_v15 = vld [vmem:[%s5573_s0 + $0x3b0] sm:$0xff]  ;;  %v265_v16 = vld [vmem:[%s5573_s0 + $0x798] sm:$0xff] }
  0xde   :  { %v1185_v26 = vpop.f32.mrf.mxu0  ;;  %v5060_v60 = vpop.f32.mrf.mxu1  ;;  %3983 = vmatmul.mubr.msk.f32.gmra.mxu1 %vm286_vm1, %v261_v46 }
  0xdf   :  { %v2669_v31 = vadd.f32 %v2668_v23, %v2414_v22  ;;  %v1186_v33 = vadd.f32 %v4864_v3, %v1185_v26  ;;  %v2417_v47 = vmax.f32 %v1191_v32, 0.0  ;;  %3985 = vmatprep.mubr.msk.f32.mxu1 %vm286_vm1, %v262_v52  ;;  %v266_v23 = vld [vmem:[%s5573_s0 + $0x7a0] sm:$0xff]  ;;  %v144_v52 = vld [vmem:[%s5573_s0 + $0x3d0] sm:$0xff] }
  0xe0   :  { %v3648_v37 = vpop.f32.mrf.mxu0  ;;  %3791 = vmatmul.mubr.msk.f32.gmra.mxu0 %vm286_vm1, %v133_v24  ;;  %v5073_v6 = vpop.f32.mrf.mxu1  ;;  %v142_v32 = vld [vmem:[%s5573_s0 + $0x3c0] sm:$0xff] }
  0xe1   :  { %v2416_v38 = vmax.f32 %v1186_v33, 0.0  ;;  %v2670_v40 = vadd.f32 %v2669_v31, %v2415_v29  ;;  %3793 = vmatprep.mubr.msk.f32.mxu0 %vm286_vm1, %v134_v27  ;;  %v1201_v49 = vadd.f32 %v3648_v37, %v4864_v3  ;;  %v267_v33 = vld [vmem:[%s5573_s0 + $0x7a8] sm:$0xff] }
  0xe2   :  { %v1195_v43 = vpop.f32.mrf.mxu0  ;;  %v5083_v13 = vpop.f32.mrf.mxu1  ;;  %3986 = vmatmul.mubr.msk.f32.gmra.mxu1 %vm286_vm1, %v263_v63  ;;  %v2998_v63 = vld [vmem:[%s5574_s3 + $0x50] sm:$0xff] }
  0xe3   :  { %v2671_v48 = vadd.f32 %v2670_v40, %v2416_v38  ;;  %v1196_v50 = vadd.f32 %v4864_v3, %v1195_v43  ;;  %v2419_v0 = vmax.f32 %v1201_v49, 0.0  ;;  %3988 = vmatprep.mubr.msk.f32.mxu1 %vm286_vm1, %v264_v7  ;;  %v268_v43 = vld [vmem:[%s5573_s0 + $0x7b0] sm:$0xff]  ;;  %4020 = vmatpush3.msra.mxu1 %v2998_v63 }
  0xe4   :  { %v3651_v55 = vpop.f32.mrf.mxu0  ;;  %3794 = vmatmul.mubr.msk.f32.gmra.mxu0 %vm286_vm1, %v135_v41  ;;  %v5095_v22 = vpop.f32.mrf.mxu1  ;;  %4021 = vmatprep.subr.mxu1 %v4050_v35  ;;  %v276_v63 = vld [vmem:[%s5573_s0 + $0x7f0] sm:$0xff] }
  0xe5   :  { %v2418_v56 = vmax.f32 %v1196_v50, 0.0  ;;  %v2672_v57 = vadd.f32 %v2671_v48, %v2417_v47  ;;  %3796 = vmatprep.mubr.msk.f32.mxu0 %vm286_vm1, %v136_v44  ;;  %v1211_v2 = vadd.f32 %v3651_v55, %v4864_v3  ;;  %v143_v48 = vld [vmem:[%s5573_s0 + $0x3c8] sm:$0xff] }
  0xe6   :  { %v1205_v61 = vpop.f32.mrf.mxu0  ;;  %v5105_v29 = vpop.f32.mrf.mxu1  ;;  %3989 = vmatmul.mubr.msk.f32.gmra.mxu1 %vm286_vm1, %v265_v16 }
  0xe7   :  { %v2673_v1 = vadd.f32 %v2672_v57, %v2418_v56  ;;  %v1206_v5 = vadd.f32 %v4864_v3, %v1205_v61  ;;  %v2421_v17 = vmax.f32 %v1211_v2, 0.0  ;;  %3991 = vmatprep.mubr.msk.f32.mxu1 %vm286_vm1, %v266_v23 }
  0xe8   :  { %v3654_v8 = vpop.f32.mrf.mxu0  ;;  %3797 = vmatmul.mubr.msk.f32.gmra.mxu0 %vm286_vm1, %v137_v58  ;;  %v5117_v41 = vpop.f32.mrf.mxu1 }
  0xe9   :  { %v2420_v9 = vmax.f32 %v1206_v5, 0.0  ;;  %v2674_v11 = vadd.f32 %v2673_v1, %v2419_v0  ;;  %3799 = vmatprep.mubr.msk.f32.mxu0 %vm286_vm1, %v138_v62  ;;  %v1221_v20 = vadd.f32 %v3654_v8, %v4864_v3  ;;  %v270_v62 = vld [vmem:[%s5573_s0 + $0x7c0] sm:$0xff]  ;;  %v145_v5 = vld [vmem:[%s5573_s0 + $0x3d8] sm:$0xff] }
  0xea   :  { %v1215_v14 = vpop.f32.mrf.mxu0  ;;  %v5127_v49 = vpop.f32.mrf.mxu1  ;;  %3992 = vmatmul.mubr.msk.f32.gmra.mxu1 %vm286_vm1, %v267_v33 }
  0xeb   :  { %v2675_v18 = vadd.f32 %v2674_v11, %v2420_v9  ;;  %v1216_v21 = vadd.f32 %v4864_v3, %v1215_v14  ;;  %v2423_v36 = vmax.f32 %v1221_v20, 0.0  ;;  %3994 = vmatprep.mubr.msk.f32.mxu1 %vm286_vm1, %v268_v43  ;;  %v146_v9 = vld [vmem:[%s5573_s0 + $0x3e0] sm:$0xff]  ;;  %v271_v11 = vld [vmem:[%s5573_s0 + $0x7c8] sm:$0xff] }
  0xec   :  { %v3657_v24 = vpop.f32.mrf.mxu0  ;;  %3800 = vmatmul.mubr.msk.f32.gmra.mxu0 %vm286_vm1, %v139_v12  ;;  %v5139_v61 = vpop.f32.mrf.mxu1 }
  0xed   :  { %v2422_v26 = vmax.f32 %v1216_v21, 0.0  ;;  %v2676_v27 = vadd.f32 %v2675_v18, %v2421_v17  ;;  %3802 = vmatprep.mubr.msk.f32.mxu0 %vm286_vm1, %v140_v15  ;;  %v1231_v38 = vadd.f32 %v3657_v24, %v4864_v3  ;;  %v272_v18 = vld [vmem:[%s5573_s0 + $0x7d0] sm:$0xff]  ;;  %v147_v24 = vld [vmem:[%s5573_s0 + $0x3e8] sm:$0xff] }
  0xee   :  { %v1225_v31 = vpop.f32.mrf.mxu0  ;;  %v5152_v7 = vpop.f32.mrf.mxu1  ;;  %3995 = vmatmul.mubr.msk.f32.gmra.mxu1 %vm286_vm1, %v269_v54  ;;  %v275_v54 = vld [vmem:[%s5573_s0 + $0x7e8] sm:$0xff] }
  0xef   :  { %v2677_v37 = vadd.f32 %v2676_v27, %v2422_v26  ;;  %v1226_v40 = vadd.f32 %v4864_v3, %v1225_v31  ;;  %v2425_v55 = vmax.f32 %v1231_v38, 0.0  ;;  %3997 = vmatprep.mubr.msk.f32.mxu1 %vm286_vm1, %v270_v62  ;;  %v273_v31 = vld [vmem:[%s5573_s0 + $0x7d8] sm:$0xff] }
  0xf0   :  { %v3660_v44 = vpop.f32.mrf.mxu0  ;;  %3803 = vmatmul.mubr.msk.f32.gmra.mxu0 %vm286_vm1, %v141_v28  ;;  %v5165_v17 = vpop.f32.mrf.mxu1  ;;  %v148_v28 = vld [vmem:[%s5573_s0 + $0x3f0] sm:$0xff] }
  0xf1   :  { %v2424_v46 = vmax.f32 %v1226_v40, 0.0  ;;  %v2678_v47 = vadd.f32 %v2677_v37, %v2423_v36  ;;  %3805 = vmatprep.mubr.msk.f32.mxu0 %vm286_vm1, %v142_v32  ;;  %v1241_v57 = vadd.f32 %v3660_v44, %v4864_v3  ;;  %v274_v40 = vld [vmem:[%s5573_s0 + $0x7e0] sm:$0xff] }
  0xf2   :  { %v1235_v50 = vpop.f32.mrf.mxu0  ;;  %v5175_v26 = vpop.f32.mrf.mxu1  ;;  %3998 = vmatmul.mubr.msk.f32.gmra.mxu1 %vm286_vm1, %v271_v11  ;;  %v277_v11 = vld [vmem:[%s5573_s0 + $0x7f8] sm:$0xff] }
  0xf3   :  { %v2679_v56 = vadd.f32 %v2678_v47, %v2424_v46  ;;  %v1236_v58 = vadd.f32 %v4864_v3, %v1235_v50  ;;  %v2427_v12 = vmax.f32 %v1241_v57, 0.0  ;;  %4000 = vmatprep.mubr.msk.f32.mxu1 %vm286_vm1, %v272_v18  ;;  %v149_v47 = vld [vmem:[%s5573_s0 + $0x3f8] sm:$0xff] }
  0xf4   :  { %v3663_v0 = vpop.f32.mrf.mxu0  ;;  %3806 = vmatmul.mubr.msk.f32.gmra.mxu0 %vm286_vm1, %v143_v48  ;;  %v5187_v38 = vpop.f32.mrf.mxu1 }
  0xf5   :  { %v2426_v1 = vmax.f32 %v1236_v58, 0.0  ;;  %v2680_v2 = vadd.f32 %v2679_v56, %v2425_v55  ;;  %3808 = vmatprep.mubr.msk.f32.mxu0 %vm286_vm1, %v144_v52  ;;  %v1251_v15 = vadd.f32 %v3663_v0, %v4864_v3  ;;  %v150_v52 = vld [vmem:[%s5573_s0 + $0x400] sm:$0xff] }
  0xf6   :  { %v1245_v8 = vpop.f32.mrf.mxu0  ;;  %v5197_v48 = vpop.f32.mrf.mxu1  ;;  %4001 = vmatmul.mubr.msk.f32.gmra.mxu1 %vm286_vm1, %v273_v31 }
  0xf7   :  { %v2681_v14 = vadd.f32 %v2680_v2, %v2426_v1  ;;  %v1246_v16 = vadd.f32 %v4864_v3, %v1245_v8  ;;  %v2429_v32 = vmax.f32 %v1251_v15, 0.0  ;;  %4003 = vmatprep.mubr.msk.f32.mxu1 %vm286_vm1, %v274_v40 }
  0xf8   :  { %v3666_v20 = vpop.f32.mrf.mxu0  ;;  %3809 = vmatmul.mubr.msk.f32.gmra.mxu0 %vm286_vm1, %v145_v5  ;;  %v5209_v62 = vpop.f32.mrf.mxu1  ;;  %v151_v5 = vld [vmem:[%s5573_s0 + $0x408] sm:$0xff] }
  0xf9   :  { %v2428_v21 = vmax.f32 %v1246_v16, 0.0  ;;  %v2682_v23 = vadd.f32 %v2681_v14, %v2427_v12  ;;  %3811 = vmatprep.mubr.msk.f32.mxu0 %vm286_vm1, %v146_v9  ;;  %v1261_v36 = vadd.f32 %v3666_v20, %v4864_v3  ;;  %v2997_v20 = vld [vmem:[%s5574_s3 + $0x48] sm:$0xff] }
  0xfa   :  { %v1255_v27 = vpop.f32.mrf.mxu0  ;;  %v5219_v8 = vpop.f32.mrf.mxu1  ;;  %4004 = vmatmul.mubr.msk.f32.gmra.mxu1 %vm286_vm1, %v275_v54 }
  0xfb   :  { %v2683_v33 = vadd.f32 %v2682_v23, %v2428_v21  ;;  %v1256_v37 = vadd.f32 %v4864_v3, %v1255_v27  ;;  %v2431_v55 = vmax.f32 %v1261_v36, 0.0  ;;  %4006 = vmatprep.mubr.msk.f32.mxu1 %vm286_vm1, %v276_v63  ;;  %4022 = vmatpush3.msra.mxu1 %v2997_v20 }
  0xfc   :  { %v3669_v43 = vpop.f32.mrf.mxu0  ;;  %3812 = vmatmul.mubr.msk.f32.gmra.mxu0 %vm286_vm1, %v147_v24  ;;  %v5228_v18 = vpop.f32.mrf.mxu1  ;;  %4023 = vmatprep.subr.mxu1 %v4050_v35 }
  0xfd   :  { %v2430_v44 = vmax.f32 %v1256_v37, 0.0  ;;  %v2684_v46 = vadd.f32 %v2683_v33, %v2429_v32  ;;  %3814 = vmatprep.mubr.msk.f32.mxu0 %vm286_vm1, %v148_v28  ;;  %v1271_v57 = vadd.f32 %v3669_v43, %v4864_v3 }
  0xfe   :  { %v1265_v50 = vpop.f32.mrf.mxu0  ;;  %v5235_v28 = vpop.f32.mrf.mxu1  ;;  %4007 = vmatmul.mubr.msk.f32.gmra.mxu1 %vm286_vm1, %v277_v11 }
  0xff   :  { %v2685_v56 = vadd.f32 %v2684_v46, %v2430_v44  ;;  %v1266_v58 = vadd.f32 %v4864_v3, %v1265_v50  ;;  %v2433_v12 = vmax.f32 %v1271_v57, 0.0  ;;  %4041 = vmatprep.mubr.msk.f32.mxu1 %vm4051_vm3, %v4050_v35 }
 0x100   :  { %v3672_v0 = vpop.f32.mrf.mxu0  ;;  %3815 = vmatmul.mubr.msk.f32.gmra.mxu0 %vm286_vm1, %v149_v47  ;;  %v5240_v37 = vpop.f32.mrf.mxu1 }
 0x101   :  { %v2432_v1 = vmax.f32 %v1266_v58, 0.0  ;;  %v2686_v2 = vadd.f32 %v2685_v56, %v2431_v55  ;;  %3817 = vmatprep.mubr.msk.f32.mxu0 %vm286_vm1, %v150_v52  ;;  %v1281_v15 = vadd.f32 %v3672_v0, %v4864_v3 }
 0x102   :  { %v1275_v9 = vpop.f32.mrf.mxu0  ;;  %v3867_v47 = vpop.f32.mrf.mxu1 }
 0x103   :  { %v2687_v14 = vadd.f32 %v2686_v2, %v2432_v1  ;;  %v1276_v16 = vadd.f32 %v4864_v3, %v1275_v9  ;;  %v2435_v32 = vmax.f32 %v1281_v15, 0.0  ;;  %v1931_v52 = vadd.f32 %v3867_v47, %v4864_v3 }
 0x104   :  { %v3675_v21 = vpop.f32.mrf.mxu0  ;;  %3818 = vmatmul.mubr.msk.f32.gmra.mxu0 %vm286_vm1, %v151_v5  ;;  %v1925_v57 = vpop.f32.mrf.mxu1 }
 0x105   :  { %v2434_v23 = vmax.f32 %v1276_v16, 0.0  ;;  %v2688_v24 = vadd.f32 %v2687_v14, %v2433_v12  ;;  %v1291_v27 = vadd.f32 %v3675_v21, %v4864_v3  ;;  %v2565_v63 = vmax.f32 %v1931_v52, 0.0 }
 0x106   :  { %v1285_v31 = vpop.f32.mrf.mxu0  ;;  %v1926_v0 = vadd.f32 %v4864_v3, %v1925_v57  ;;  %v3870_v2 = vpop.f32.mrf.mxu1 }
 0x107   :  { %v2689_v33 = vadd.f32 %v2688_v24, %v2434_v23  ;;  %v1286_v36 = vadd.f32 %v4864_v3, %v1285_v31  ;;  %v2437_v44 = vmax.f32 %v1291_v27, 0.0  ;;  %v1941_v11 = vadd.f32 %v3870_v2, %v4864_v3 }
 0x108   :  { %v3678_v40 = vpop.f32.mrf.mxu0  ;;  %v2564_v9 = vmax.f32 %v1926_v0, 0.0  ;;  %v1935_v20 = vpop.f32.mrf.mxu1 }
 0x109   :  { %v5242_v43 = vadd.f32 %v2689_v33, %v2435_v32  ;;  %v2436_v46 = vmax.f32 %v1286_v36, 0.0  ;;  %v1301_v55 = vadd.f32 %v3678_v40, %v4864_v3  ;;  %v1936_v24 = vadd.f32 %v4864_v3, %v1935_v20 }
 0x10a   :  { %v1295_v50 = vpop.f32.mrf.mxu0  ;;  %v2845_v23 = vadd.f32 %v2565_v63, %v2564_v9  ;;  %v3873_v32 = vpop.f32.mrf.mxu1  ;;  %v2567_v36 = vmax.f32 %v1941_v11, 0.0 }
 0x10b   :  { %v2697_v54 = vadd.f32 %v2437_v44, %v2436_v46  ;;  %v1296_v56 = vadd.f32 %v4864_v3, %v1295_v50  ;;  %v2439_v12 = vmax.f32 %v1301_v55, 0.0  ;;  %v2566_v40 = vmax.f32 %v1936_v24, 0.0 }
 0x10c   :  { %v3681_v58 = vpop.f32.mrf.mxu0  ;;  %v1951_v44 = vadd.f32 %v3873_v32, %v4864_v3 }
 0x10d   :  { %v2438_v1 = vmax.f32 %v1296_v56, 0.0  ;;  %v1311_v15 = vadd.f32 %v3681_v58, %v4864_v3  ;;  %v2846_v56 = vadd.f32 %v2845_v23, %v2566_v40 }
 0x10e   :  { %v1305_v5 = vpop.f32.mrf.mxu0  ;;  %v2569_v2 = vmax.f32 %v1951_v44, 0.0 }
 0x10f   :  { %v2698_v14 = vadd.f32 %v2697_v54, %v2438_v1  ;;  %v1306_v16 = vadd.f32 %v4864_v3, %v1305_v5  ;;  %v2441_v46 = vmax.f32 %v1311_v15, 0.0  ;;  %v1945_v54 = vpop.f32.mrf.mxu1  ;;  %v2847_v9 = vadd.f32 %v2846_v56, %v2567_v36 }
 0x110   :  { %v3684_v21 = vpop.f32.mrf.mxu0  ;;  %v1946_v57 = vadd.f32 %v4864_v3, %v1945_v54 }
 0x111   :  { %v2440_v27 = vmax.f32 %v1306_v16, 0.0  ;;  %v2699_v31 = vadd.f32 %v2698_v14, %v2439_v12  ;;  %v1321_v50 = vadd.f32 %v3684_v21, %v4864_v3  ;;  %v3876_v0 = vpop.f32.mrf.mxu1 }
 0x112   :  { %v1315_v33 = vpop.f32.mrf.mxu0  ;;  %v2568_v5 = vmax.f32 %v1946_v57, 0.0  ;;  %v1961_v11 = vadd.f32 %v3876_v0, %v4864_v3 }
 0x113   :  { %v2700_v47 = vadd.f32 %v2699_v31, %v2440_v27  ;;  %v1316_v52 = vadd.f32 %v4864_v3, %v1315_v33  ;;  %v2443_v12 = vmax.f32 %v1321_v50, 0.0  ;;  %v1955_v20 = vpop.f32.mrf.mxu1  ;;  %v2996_v33 = vld [vmem:[%s5574_s3 + $0x40] sm:$0xff] }
 0x114   :  { %v3687_v55 = vpop.f32.mrf.mxu0  ;;  %v2848_v23 = vadd.f32 %v2847_v9, %v2568_v5  ;;  %v1956_v24 = vadd.f32 %v4864_v3, %v1955_v20  ;;  %v2571_v40 = vmax.f32 %v1961_v11, 0.0  ;;  %4024 = vmatpush3.msra.mxu1 %v2996_v33 }
 0x115   :  { %v2442_v58 = vmax.f32 %v1316_v52, 0.0  ;;  %v2701_v63 = vadd.f32 %v2700_v47, %v2441_v46  ;;  %v1331_v15 = vadd.f32 %v3687_v55, %v4864_v3  ;;  %v3879_v32 = vpop.f32.mrf.mxu1  ;;  %4025 = vmatprep.subr.mxu1 %v4050_v35 }
 0x116   :  { %v1325_v1 = vpop.f32.mrf.mxu0  ;;  %v2570_v44 = vmax.f32 %v1956_v24, 0.0  ;;  %v2849_v46 = vadd.f32 %v2848_v23, %v2569_v2  ;;  %v1971_v47 = vadd.f32 %v3879_v32, %v4864_v3  ;;  %v2995_v24 = vld [vmem:[%s5574_s3 + $0x38] sm:$0xff] }
 0x117   :  { %v2702_v14 = vadd.f32 %v2701_v63, %v2442_v58  ;;  %v1326_v16 = vadd.f32 %v4864_v3, %v1325_v1  ;;  %v2445_v50 = vmax.f32 %v1331_v15, 0.0  ;;  %v1965_v56 = vpop.f32.mrf.mxu1  ;;  %4026 = vmatpush3.msra.mxu1 %v2995_v24 }
 0x118   :  { %v3690_v21 = vpop.f32.mrf.mxu0  ;;  %v2850_v58 = vadd.f32 %v2849_v46, %v2570_v44  ;;  %v1966_v63 = vadd.f32 %v4864_v3, %v1965_v56  ;;  %v2573_v9 = vmax.f32 %v1971_v47, 0.0  ;;  %4027 = vmatprep.subr.mxu1 %v4050_v35 }
 0x119   :  { %v2444_v27 = vmax.f32 %v1326_v16, 0.0  ;;  %v2703_v31 = vadd.f32 %v2702_v14, %v2443_v12  ;;  %v1341_v54 = vadd.f32 %v3690_v21, %v4864_v3  ;;  %v3882_v5 = vpop.f32.mrf.mxu1 }
 0x11a   :  { %v1335_v36 = vpop.f32.mrf.mxu0  ;;  %v2572_v11 = vmax.f32 %v1966_v63, 0.0  ;;  %v2851_v12 = vadd.f32 %v2850_v58, %v2571_v40  ;;  %v1981_v14 = vadd.f32 %v3882_v5, %v4864_v3 }
 0x11b   :  { %v2704_v52 = vadd.f32 %v2703_v31, %v2444_v27  ;;  %v1336_v55 = vadd.f32 %v4864_v3, %v1335_v36  ;;  %v2447_v15 = vmax.f32 %v1341_v54, 0.0  ;;  %v1975_v23 = vpop.f32.mrf.mxu1 }
 0x11c   :  { %v3693_v57 = vpop.f32.mrf.mxu0  ;;  %v2852_v31 = vadd.f32 %v2851_v12, %v2572_v11  ;;  %v1976_v32 = vadd.f32 %v4864_v3, %v1975_v23  ;;  %v2575_v46 = vmax.f32 %v1981_v14, 0.0 }
 0x11d   :  { %v2446_v0 = vmax.f32 %v1336_v55, 0.0  ;;  %v2705_v1 = vadd.f32 %v2704_v52, %v2445_v50  ;;  %v1351_v20 = vadd.f32 %v3693_v57, %v4864_v3  ;;  %v3885_v40 = vpop.f32.mrf.mxu1 }
 0x11e   :  { %v1345_v2 = vpop.f32.mrf.mxu0  ;;  %v2574_v47 = vmax.f32 %v1976_v32, 0.0  ;;  %v2853_v50 = vadd.f32 %v2852_v31, %v2573_v9  ;;  %v1991_v52 = vadd.f32 %v3885_v40, %v4864_v3 }
 0x11f   :  { %v2706_v16 = vadd.f32 %v2705_v1, %v2446_v0  ;;  %v1346_v21 = vadd.f32 %v4864_v3, %v1345_v2  ;;  %v2449_v54 = vmax.f32 %v1351_v20, 0.0  ;;  %v1985_v58 = vpop.f32.mrf.mxu1 }
 0x120   :  { %v3696_v27 = vpop.f32.mrf.mxu0  ;;  %v2854_v0 = vadd.f32 %v2853_v50, %v2574_v47  ;;  %v1986_v1 = vadd.f32 %v4864_v3, %v1985_v58  ;;  %v2577_v14 = vmax.f32 %v1991_v52, 0.0 }
 0x121   :  { %v2448_v33 = vmax.f32 %v1346_v21, 0.0  ;;  %v2707_v36 = vadd.f32 %v2706_v16, %v2447_v15  ;;  %v1361_v56 = vadd.f32 %v3696_v27, %v4864_v3  ;;  %v3888_v11 = vpop.f32.mrf.mxu1 }
 0x122   :  { %v1355_v44 = vpop.f32.mrf.mxu0  ;;  %v2576_v15 = vmax.f32 %v1986_v1, 0.0  ;;  %v2855_v9 = vadd.f32 %v2854_v0, %v2575_v46  ;;  %v2001_v16 = vadd.f32 %v3888_v11, %v4864_v3 }
 0x123   :  { %v2708_v55 = vadd.f32 %v2707_v36, %v2448_v33  ;;  %v1356_v57 = vadd.f32 %v4864_v3, %v1355_v44  ;;  %v2451_v20 = vmax.f32 %v1361_v56, 0.0  ;;  %v1995_v27 = vpop.f32.mrf.mxu1 }
 0x124   :  { %v3699_v63 = vpop.f32.mrf.mxu0  ;;  %v2856_v32 = vadd.f32 %v2855_v9, %v2576_v15  ;;  %v1996_v33 = vadd.f32 %v4864_v3, %v1995_v27  ;;  %v2579_v50 = vmax.f32 %v2001_v16, 0.0 }
 0x125   :  { %v2450_v5 = vmax.f32 %v1356_v57, 0.0  ;;  %v2709_v2 = vadd.f32 %v2708_v55, %v2449_v54  ;;  %v1371_v23 = vadd.f32 %v3699_v63, %v4864_v3  ;;  %v3891_v44 = vpop.f32.mrf.mxu1 }
 0x126   :  { %v1365_v12 = vpop.f32.mrf.mxu0  ;;  %v2578_v52 = vmax.f32 %v1996_v33, 0.0  ;;  %v2857_v46 = vadd.f32 %v2856_v32, %v2577_v14  ;;  %v2011_v54 = vadd.f32 %v3891_v44, %v4864_v3  ;;  %v2994_v32 = vld [vmem:[%s5574_s3 + $0x30] sm:$0xff] }
 0x127   :  { %v2710_v21 = vadd.f32 %v2709_v2, %v2450_v5  ;;  %v1366_v24 = vadd.f32 %v4864_v3, %v1365_v12  ;;  %v2453_v55 = vmax.f32 %v1371_v23, 0.0  ;;  %v2005_v63 = vpop.f32.mrf.mxu1  ;;  %4028 = vmatpush3.msra.mxu1 %v2994_v32 }
 0x128   :  { %v3702_v31 = vpop.f32.mrf.mxu0  ;;  %v2858_v1 = vadd.f32 %v2857_v46, %v2578_v52  ;;  %v2006_v5 = vadd.f32 %v4864_v3, %v2005_v63  ;;  %v2581_v9 = vmax.f32 %v2011_v54, 0.0  ;;  %4029 = vmatprep.subr.mxu1 %v4050_v35 }
 0x129   :  { %v2452_v36 = vmax.f32 %v1366_v24, 0.0  ;;  %v2711_v40 = vadd.f32 %v2710_v21, %v2451_v20  ;;  %v1381_v57 = vadd.f32 %v3702_v31, %v4864_v3  ;;  %v3894_v12 = vpop.f32.mrf.mxu1 }
 0x12a   :  { %v1375_v47 = vpop.f32.mrf.mxu0  ;;  %v2580_v16 = vmax.f32 %v2006_v5, 0.0  ;;  %v2859_v14 = vadd.f32 %v2858_v1, %v2579_v50  ;;  %v2021_v20 = vadd.f32 %v3894_v12, %v4864_v3 }
 0x12b   :  { %v2712_v56 = vadd.f32 %v2711_v40, %v2452_v36  ;;  %v1376_v58 = vadd.f32 %v4864_v3, %v1375_v47  ;;  %v2455_v21 = vmax.f32 %v1381_v57, 0.0  ;;  %v2015_v31 = vpop.f32.mrf.mxu1 }
 0x12c   :  { %v3705_v0 = vpop.f32.mrf.mxu0  ;;  %v2860_v36 = vadd.f32 %v2859_v14, %v2580_v16  ;;  %v2016_v40 = vadd.f32 %v4864_v3, %v2015_v31  ;;  %v2583_v46 = vmax.f32 %v2021_v20, 0.0 }
 0x12d   :  { %v2454_v2 = vmax.f32 %v1376_v58, 0.0  ;;  %v2713_v11 = vadd.f32 %v2712_v56, %v2453_v55  ;;  %v1391_v24 = vadd.f32 %v3705_v0, %v4864_v3  ;;  %v3897_v50 = vpop.f32.mrf.mxu1 }
 0x12e   :  { %v1385_v15 = vpop.f32.mrf.mxu0  ;;  %v2582_v54 = vmax.f32 %v2016_v40, 0.0  ;;  %v2861_v55 = vadd.f32 %v2860_v36, %v2581_v9  ;;  %v2031_v56 = vadd.f32 %v3897_v50, %v4864_v3 }
 0x12f   :  { %v2714_v23 = vadd.f32 %v2713_v11, %v2454_v2  ;;  %v1386_v27 = vadd.f32 %v4864_v3, %v1385_v15  ;;  %v2457_v57 = vmax.f32 %v1391_v24, 0.0  ;;  %v2025_v1 = vpop.f32.mrf.mxu1 }
 0x130   :  { %v3708_v33 = vpop.f32.mrf.mxu0  ;;  %v2862_v2 = vadd.f32 %v2861_v55, %v2582_v54  ;;  %v2026_v11 = vadd.f32 %v4864_v3, %v2025_v1  ;;  %v2585_v20 = vmax.f32 %v2031_v56, 0.0 }
 0x131   :  { %v2456_v44 = vmax.f32 %v1386_v27, 0.0  ;;  %v2715_v47 = vadd.f32 %v2714_v23, %v2455_v21  ;;  %v1401_v63 = vadd.f32 %v3708_v33, %v4864_v3  ;;  %v3900_v16 = vpop.f32.mrf.mxu1 }
 0x132   :  { %v1395_v52 = vpop.f32.mrf.mxu0  ;;  %v2584_v21 = vmax.f32 %v2026_v11, 0.0  ;;  %v2863_v9 = vadd.f32 %v2862_v2, %v2583_v46  ;;  %v2041_v23 = vadd.f32 %v3900_v16, %v4864_v3  ;;  %v2691_v11 = vrot.slane %v5242_v43, 4 }
 0x133   :  { %v2716_v58 = vadd.f32 %v2715_v47, %v2456_v44  ;;  %v1396_v0 = vadd.f32 %v4864_v3, %v1395_v52  ;;  %v2459_v24 = vmax.f32 %v1401_v63, 0.0  ;;  %v2035_v33 = vpop.f32.mrf.mxu1 }
 0x134   :  { %v3711_v5 = vpop.f32.mrf.mxu0  ;;  %v2864_v40 = vadd.f32 %v2863_v9, %v2584_v21  ;;  %v2036_v44 = vadd.f32 %v4864_v3, %v2035_v33  ;;  %v2587_v55 = vmax.f32 %v2041_v23, 0.0 }
 0x135   :  { %v2458_v12 = vmax.f32 %v1396_v0, 0.0  ;;  %v2717_v15 = vadd.f32 %v2716_v58, %v2457_v57  ;;  %v1411_v31 = vadd.f32 %v3711_v5, %v4864_v3  ;;  %v3903_v52 = vpop.f32.mrf.mxu1  ;;  %v5308_v0 = vld [vmem:[%s5575_s2] ss:$0 sm:$0xff] }
 0x136   :  { %v1405_v14 = vpop.f32.mrf.mxu0  ;;  %v2586_v56 = vmax.f32 %v2036_v44, 0.0  ;;  %v2865_v46 = vadd.f32 %v2864_v40, %v2585_v20  ;;  %v2051_v57 = vadd.f32 %v3903_v52, %v4864_v3  ;;  %v2993_v44 = vld [vmem:[%s5574_s3 + $0x28] sm:$0xff] }
 0x137   :  { %v2718_v27 = vadd.f32 %v2717_v15, %v2458_v12  ;;  %v1406_v32 = vadd.f32 %v4864_v3, %v1405_v14  ;;  %v2461_v58 = vmax.f32 %v1411_v31, 0.0  ;;  %v2045_v2 = vpop.f32.mrf.mxu1  ;;  %4030 = vmatpush3.msra.mxu1 %v2993_v44 }
 0x138   :  { %v3714_v36 = vpop.f32.mrf.mxu0  ;;  %v2866_v15 = vadd.f32 %v2865_v46, %v2586_v56  ;;  %v2046_v16 = vadd.f32 %v5308_v0, %v2045_v2  ;;  %v2589_v9 = vmax.f32 %v2051_v57, 0.0  ;;  %4031 = vmatprep.subr.mxu1 %v4050_v35 }
 0x139   :  { %v2460_v47 = vmax.f32 %v1406_v32, 0.0  ;;  %v2719_v50 = vadd.f32 %v2718_v27, %v2459_v24  ;;  %v1421_v1 = vadd.f32 %v5308_v0, %v3714_v36  ;;  %v3906_v20 = vpop.f32.mrf.mxu1 }
 0x13a   :  { %v1415_v54 = vpop.f32.mrf.mxu0  ;;  %v2588_v23 = vmax.f32 %v2046_v16, 0.0  ;;  %v2867_v24 = vadd.f32 %v2866_v15, %v2587_v55  ;;  %v2061_v27 = vadd.f32 %v5308_v0, %v3906_v20 }
 0x13b   :  { %v2720_v63 = vadd.f32 %v2719_v50, %v2460_v47  ;;  %v1416_v5 = vadd.f32 %v5308_v0, %v1415_v54  ;;  %v2463_v31 = vmax.f32 %v1421_v1, 0.0  ;;  %v2055_v40 = vpop.f32.mrf.mxu1  ;;  %v2692_v47 = vadd.f32 %v2691_v11, %v5242_v43 }
 0x13c   :  { %v3717_v12 = vpop.f32.mrf.mxu0  ;;  %v2868_v52 = vadd.f32 %v2867_v24, %v2588_v23  ;;  %v2056_v54 = vadd.f32 %v5308_v0, %v2055_v40 }
 0x13d   :  { %v2462_v14 = vmax.f32 %v1416_v5, 0.0  ;;  %v2721_v3 = vadd.f32 %v2720_v63, %v2461_v58  ;;  %v1431_v33 = vadd.f32 %v5308_v0, %v3717_v12  ;;  %v3909_v46 = vpop.f32.mrf.mxu1  ;;  %v2591_v58 = vmax.f32 %v2061_v27, 0.0 }
 0x13e   :  { %v1425_v21 = vpop.f32.mrf.mxu0  ;;  %v2590_v63 = vmax.f32 %v2056_v54, 0.0  ;;  %v2869_v1 = vadd.f32 %v2868_v52, %v2589_v9  ;;  %v2071_v5 = vadd.f32 %v5308_v0, %v3909_v46  ;;  %v2693_v16 = vrot.slane %v2692_v47, 2 }
 0x13f   :  { %v2722_v32 = vadd.f32 %v2721_v3, %v2462_v14  ;;  %v1426_v36 = vadd.f32 %v5308_v0, %v1425_v21  ;;  %v2465_v2 = vmax.f32 %v1431_v33, 0.0  ;;  %v2065_v15 = vpop.f32.mrf.mxu1 }
 0x140   :  { %v3720_v50 = vpop.f32.mrf.mxu0  ;;  %v2870_v3 = vadd.f32 %v2869_v1, %v2590_v63  ;;  %v2066_v20 = vadd.f32 %v5308_v0, %v2065_v15  ;;  %v2694_v54 = vadd.f32 %v2693_v16, %v2692_v47 }
 0x141   :  { %v2464_v55 = vmax.f32 %v1426_v36, 0.0  ;;  %v2723_v56 = vadd.f32 %v2722_v32, %v2463_v31  ;;  %v1441_v43 = vadd.f32 %v5308_v0, %v3720_v50  ;;  %v3912_v27 = vpop.f32.mrf.mxu1  ;;  %v2593_v31 = vmax.f32 %v2071_v5, 0.0 }
 0x142   :  { %v1435_v57 = vpop.f32.mrf.mxu0  ;;  %v2592_v32 = vmax.f32 %v2066_v20, 0.0  ;;  %v2871_v33 = vadd.f32 %v2870_v3, %v2591_v58  ;;  %v2081_v36 = vadd.f32 %v5308_v0, %v3912_v27  ;;  %v2695_v20 = vrot.slane %v2694_v54, 1 }
 0x143   :  { %v2724_v12 = vadd.f32 %v2723_v56, %v2464_v55  ;;  %v1436_v11 = vadd.f32 %v5308_v0, %v1435_v57  ;;  %v2467_v40 = vmax.f32 %v1441_v43, 0.0  ;;  %v2075_v52 = vpop.f32.mrf.mxu1 }
 0x144   :  { %v3723_v14 = vpop.f32.mrf.mxu0  ;;  %v2872_v56 = vadd.f32 %v2871_v33, %v2592_v32  ;;  %v2076_v46 = vadd.f32 %v5308_v0, %v2075_v52 }
 0x145   :  { %v2466_v21 = vmax.f32 %v1436_v11, 0.0  ;;  %v2725_v23 = vadd.f32 %v2724_v12, %v2465_v2  ;;  %v1451_v24 = vadd.f32 %v5308_v0, %v3723_v14  ;;  %v2595_v2 = vmax.f32 %v2081_v36, 0.0  ;;  %v3915_v12 = vpop.f32.mrf.mxu1 }
 0x146   :  { %v1445_v9 = vpop.f32.mrf.mxu0  ;;  %v2594_v11 = vmax.f32 %v2076_v46, 0.0  ;;  %v2873_v15 = vadd.f32 %v2872_v56, %v2593_v31  ;;  %v2091_v43 = vadd.f32 %v5308_v0, %v3915_v12 }
 0x147   :  { %v2726_v44 = vadd.f32 %v2725_v23, %v2466_v21  ;;  %v1446_v50 = vadd.f32 %v5308_v0, %v1445_v9  ;;  %v2469_v63 = vmax.f32 %v1451_v24, 0.0  ;;  %v2085_v16 = vpop.f32.mrf.mxu1 }
 0x148   :  { %v3726_v55 = vpop.f32.mrf.mxu0  ;;  %v2874_v23 = vadd.f32 %v2873_v15, %v2594_v11  ;;  %v2597_v27 = vmax.f32 %v2091_v43, 0.0  ;;  %v2086_v24 = vadd.f32 %v5308_v0, %v2085_v16 }
 0x149   :  { %v2727_v57 = vadd.f32 %v2726_v44, %v2467_v40  ;;  %v2468_v1 = vmax.f32 %v1446_v50, 0.0  ;;  %v1461_v5 = vadd.f32 %v5308_v0, %v3726_v55  ;;  %v3918_v33 = vpop.f32.mrf.mxu1 }
 0x14a   :  { %v1455_v58 = vpop.f32.mrf.mxu0  ;;  %v5335_v44 = vadd.f32 %v2874_v23, %v2595_v2  ;;  %v2596_v31 = vmax.f32 %v2086_v24, 0.0  ;;  %v2101_v50 = vadd.f32 %v5308_v0, %v3918_v33 }
 0x14b   :  { %v2728_v14 = vrot.slane %v2727_v57, 4  ;;  %v2734_v3 = vadd.f32 %v2469_v63, %v2468_v1  ;;  %v1456_v47 = vadd.f32 %v5308_v0, %v1455_v58  ;;  %v2471_v36 = vmax.f32 %v1461_v5, 0.0  ;;  %v2095_v63 = vpop.f32.mrf.mxu1 }
 0x14c   :  { %v3729_v21 = vpop.f32.mrf.mxu0  ;;  %v2696_v1 = vadd.f32 %v2695_v20, %v2694_v54  ;;  %v2882_v58 = vadd.f32 %v2597_v27, %v2596_v31 }
 0x14d   :  { %v2729_v9 = vadd.f32 %v2728_v14, %v2727_v57  ;;  %v2470_v32 = vmax.f32 %v1456_v47, 0.0  ;;  %v1471_v56 = vadd.f32 %v5308_v0, %v3729_v21  ;;  %v2096_v57 = vadd.f32 %v5308_v0, %v2095_v63  ;;  %v3921_v43 = vpop.f32.mrf.mxu1 }
 0x14e   :  { %v1465_v40 = vpop.f32.mrf.mxu0  ;;  %v2599_v47 = vmax.f32 %v2101_v50, 0.0  ;;  %v2956_v27 = vmul.f32 0.00390625, %v2696_v1 }
 0x14f   :  { %v2730_v52 = vrot.slane %v2729_v9, 2  ;;  %v2735_v55 = vadd.f32 %v2734_v3, %v2470_v32  ;;  %v1466_v46 = vadd.f32 %v5308_v0, %v1465_v40  ;;  %v2598_v16 = vmax.f32 %v2096_v57, 0.0  ;;  %v2105_v20 = vpop.f32.mrf.mxu1 }
 0x150   :  { %v3732_v12 = vpop.f32.mrf.mxu0  ;;  %v2111_v3 = vadd.f32 %v5308_v0, %v3921_v43  ;;  %v2473_v23 = vmax.f32 %v1471_v56, 0.0  ;;  %v2106_v33 = vadd.f32 %v5308_v0, %v2105_v20 }
 0x151   :  { %v2731_v11 = vadd.f32 %v2730_v52, %v2729_v9  ;;  %v2472_v5 = vmax.f32 %v1466_v46, 0.0  ;;  %v2736_v15 = vadd.f32 %v2735_v55, %v2471_v36  ;;  %v1481_v2 = vadd.f32 %v5308_v0, %v3732_v12  ;;  %v3924_v50 = vpop.f32.mrf.mxu1 }
 0x152   :  { %v1475_v14 = vpop.f32.mrf.mxu0  ;;  %v2883_v9 = vadd.f32 %v2882_v58, %v2598_v16  ;;  %v2601_v46 = vmax.f32 %v2111_v3, 0.0  ;;  %v2600_v63 = vmax.f32 %v2106_v33, 0.0  ;;  %v2121_v56 = vadd.f32 %v5308_v0, %v3924_v50 }
 0x153   :  { %v2732_v21 = vrot.slane %v2731_v11, 1  ;;  %v2737_v24 = vadd.f32 %v2736_v15, %v2472_v5  ;;  %v1476_v54 = vadd.f32 %v5308_v0, %v1475_v14  ;;  %v2475_v40 = vmax.f32 %v1481_v2, 0.0  ;;  %v2115_v58 = vpop.f32.mrf.mxu1 }
 0x154   :  { %v3735_v32 = vpop.f32.mrf.mxu0  ;;  %v2884_v12 = vadd.f32 %v2883_v9, %v2599_v47 }
 0x155   :  { %v2733_v36 = vadd.f32 %v2732_v21, %v2731_v11  ;;  %v2474_v31 = vmax.f32 %v1476_v54, 0.0  ;;  %v2738_v52 = vadd.f32 %v2737_v24, %v2473_v23  ;;  %v1491_v1 = vadd.f32 %v5308_v0, %v3735_v32  ;;  %v3927_v21 = vpop.f32.mrf.mxu1 }
 0x156   :  { %v1485_v55 = vpop.f32.mrf.mxu0  ;;  %v2885_v14 = vadd.f32 %v2884_v12, %v2600_v63  ;;  %v2116_v11 = vadd.f32 %v5308_v0, %v2115_v58  ;;  %v2603_v23 = vmax.f32 %v2121_v56, 0.0  ;;  %v2131_v20 = vadd.f32 %v5308_v0, %v3927_v21 }
 0x157   :  { %v2957_v57 = vmul.f32 0.00390625, %v2733_v36  ;;  %v2739_v5 = vadd.f32 %v2738_v52, %v2474_v31  ;;  %v1486_v15 = vadd.f32 %v5308_v0, %v1485_v55  ;;  %v2477_v32 = vmax.f32 %v1491_v1, 0.0  ;;  %v2125_v31 = vpop.f32.mrf.mxu1 }
 0x158   :  { %v3738_v43 = vpop.f32.mrf.mxu0  ;;  %v2602_v24 = vmax.f32 %v2116_v11, 0.0  ;;  %v2886_v54 = vadd.f32 %v2885_v14, %v2601_v46  ;;  %v2605_v56 = vmax.f32 %v2131_v20, 0.0 }
 0x159   :  { %v5350_v2 = vsel %vm2972_vm2, %v2957_v57, %v2956_v27  ;;  %v2476_v16 = vmax.f32 %v1486_v15, 0.0  ;;  %v2740_v3 = vadd.f32 %v2739_v5, %v2475_v40  ;;  %v1501_v33 = vadd.f32 %v5308_v0, %v3738_v43  ;;  %v3930_v63 = vpop.f32.mrf.mxu1 }
 0x15a   :  { %v1495_v47 = vpop.f32.mrf.mxu0  ;;  %v2887_v50 = vadd.f32 %v2886_v54, %v2602_v24  ;;  %v2126_v27 = vadd.f32 %v5308_v0, %v2125_v31  ;;  %v2141_v5 = vadd.f32 %v5308_v0, %v3930_v63 }
 0x15b   :  { %v2741_v9 = vadd.f32 %v2740_v3, %v2476_v16  ;;  %v1496_v36 = vadd.f32 %v5308_v0, %v1495_v47  ;;  %v2479_v1 = vmax.f32 %v1501_v33, 0.0  ;;  %v2135_v14 = vpop.f32.mrf.mxu1 }
 0x15c   :  { %v3741_v52 = vpop.f32.mrf.mxu0  ;;  %v2604_v57 = vmax.f32 %v2126_v27, 0.0  ;;  %v2888_v46 = vadd.f32 %v2887_v50, %v2603_v23  ;;  %v2136_v3 = vadd.f32 %v5308_v0, %v2135_v14  ;;  %v2607_v20 = vmax.f32 %v2141_v5, 0.0 }
 0x15d   :  { %v2478_v55 = vmax.f32 %v1496_v36, 0.0  ;;  %v2742_v40 = vadd.f32 %v2741_v9, %v2477_v32  ;;  %v1511_v58 = vadd.f32 %v5308_v0, %v3741_v52  ;;  %v3933_v24 = vpop.f32.mrf.mxu1 }
 0x15e   :  { %v1505_v12 = vpop.f32.mrf.mxu0  ;;  %v2889_v16 = vadd.f32 %v2888_v46, %v2604_v57  ;;  %v2606_v32 = vmax.f32 %v2136_v3, 0.0  ;;  %v2151_v9 = vadd.f32 %v5308_v0, %v3933_v24 }
 0x15f   :  { %v2743_v15 = vadd.f32 %v2742_v40, %v2478_v55  ;;  %v1506_v43 = vadd.f32 %v5308_v0, %v1505_v12  ;;  %v2481_v33 = vmax.f32 %v1511_v58, 0.0  ;;  %v2145_v50 = vpop.f32.mrf.mxu1 }
 0x160   :  { %v3744_v11 = vpop.f32.mrf.mxu0  ;;  %v2890_v23 = vadd.f32 %v2889_v16, %v2605_v56  ;;  %v2146_v40 = vadd.f32 %v5308_v0, %v2145_v50  ;;  %v2609_v5 = vmax.f32 %v2151_v9, 0.0 }
 0x161   :  { %v2480_v21 = vmax.f32 %v1506_v43, 0.0  ;;  %v2744_v47 = vadd.f32 %v2743_v15, %v2479_v1  ;;  %v1521_v31 = vadd.f32 %v5308_v0, %v3744_v11  ;;  %v3936_v57 = vpop.f32.mrf.mxu1 }
 0x162   :  { %v1515_v54 = vpop.f32.mrf.mxu0  ;;  %v2891_v55 = vadd.f32 %v2890_v23, %v2606_v32  ;;  %v2608_v1 = vmax.f32 %v2146_v40, 0.0  ;;  %v2161_v15 = vadd.f32 %v5308_v0, %v3936_v57 }
 0x163   :  { %v2745_v36 = vadd.f32 %v2744_v47, %v2480_v21  ;;  %v1516_v52 = vadd.f32 %v5308_v0, %v1515_v54  ;;  %v2483_v58 = vmax.f32 %v1521_v31, 0.0  ;;  %v2155_v16 = vpop.f32.mrf.mxu1 }
 0x164   :  { %v3747_v27 = vpop.f32.mrf.mxu0  ;;  %v2892_v56 = vadd.f32 %v2891_v55, %v2607_v20  ;;  %v2156_v47 = vadd.f32 %v5308_v0, %v2155_v16  ;;  %v2611_v9 = vmax.f32 %v2161_v15, 0.0 }
 0x165   :  { %v2482_v63 = vmax.f32 %v1516_v52, 0.0  ;;  %v2746_v12 = vadd.f32 %v2745_v36, %v2481_v33  ;;  %v1531_v14 = vadd.f32 %v5308_v0, %v3747_v27  ;;  %v3939_v32 = vpop.f32.mrf.mxu1 }
 0x166   :  { %v1525_v46 = vpop.f32.mrf.mxu0  ;;  %v2893_v21 = vadd.f32 %v2892_v56, %v2608_v1  ;;  %v2610_v33 = vmax.f32 %v2156_v47, 0.0  ;;  %v2171_v36 = vadd.f32 %v5308_v0, %v3939_v32 }
 0x167   :  { %v2747_v43 = vadd.f32 %v2746_v12, %v2482_v63  ;;  %v1526_v11 = vadd.f32 %v5308_v0, %v1525_v46  ;;  %v2485_v31 = vmax.f32 %v1531_v14, 0.0  ;;  %v2165_v55 = vpop.f32.mrf.mxu1 }
 0x168   :  { %v3750_v3 = vpop.f32.mrf.mxu0  ;;  %v2894_v20 = vadd.f32 %v2893_v21, %v2609_v5  ;;  %v2166_v12 = vadd.f32 %v5308_v0, %v2165_v55  ;;  %v2613_v5 = vmax.f32 %v2171_v36, 0.0 }
 0x169   :  { %v2484_v24 = vmax.f32 %v1526_v11, 0.0  ;;  %v2748_v54 = vadd.f32 %v2747_v43, %v2483_v58  ;;  %v1541_v50 = vadd.f32 %v5308_v0, %v3750_v3  ;;  %v3942_v56 = vpop.f32.mrf.mxu1 }
 0x16a   :  { %v1535_v23 = vpop.f32.mrf.mxu0  ;;  %v2895_v63 = vadd.f32 %v2894_v20, %v2610_v33  ;;  %v2612_v58 = vmax.f32 %v2166_v12, 0.0  ;;  %v2181_v14 = vadd.f32 %v5308_v0, %v3942_v56  ;;  %v2992_v12 = vld [vmem:[%s5574_s3 + $0x20] sm:$0xff] }
 0x16b   :  { %v2749_v52 = vadd.f32 %v2748_v54, %v2484_v24  ;;  %v1536_v27 = vadd.f32 %v5308_v0, %v1535_v23  ;;  %v2487_v11 = vmax.f32 %v1541_v50, 0.0  ;;  %v2175_v21 = vpop.f32.mrf.mxu1  ;;  %4032 = vmatpush3.msra.mxu1 %v2992_v12 }
 0x16c   :  { %v3753_v40 = vpop.f32.mrf.mxu0  ;;  %v2896_v43 = vadd.f32 %v2895_v63, %v2611_v9  ;;  %v2176_v54 = vadd.f32 %v5308_v0, %v2175_v21  ;;  %4033 = vmatprep.subr.mxu1 %v4050_v35 }
 0x16d   :  { %v2486_v57 = vmax.f32 %v1536_v27, 0.0  ;;  %v2750_v46 = vadd.f32 %v2749_v52, %v2485_v31  ;;  %v1551_v1 = vadd.f32 %v5308_v0, %v3753_v40  ;;  %v3945_v20 = vpop.f32.mrf.mxu1  ;;  %v2615_v52 = vmax.f32 %v2181_v14, 0.0 }
 0x16e   :  { %v1545_v15 = vpop.f32.mrf.mxu0  ;;  %v2897_v24 = vadd.f32 %v2896_v43, %v2612_v58  ;;  %v2614_v36 = vmax.f32 %v2176_v54, 0.0  ;;  %v2191_v9 = vadd.f32 %v5308_v0, %v3945_v20  ;;  %v2990_v43 = vld [vmem:[%s5574_s3 + $0x10] sm:$0xff] }
 0x16f   :  { %v2751_v16 = vadd.f32 %v2750_v46, %v2486_v57  ;;  %v1546_v3 = vadd.f32 %v5308_v0, %v1545_v15  ;;  %v2489_v32 = vmax.f32 %v1551_v1, 0.0  ;;  %v2185_v63 = vpop.f32.mrf.mxu1  ;;  %v2991_v57 = vld [vmem:[%s5574_s3 + $0x18] sm:$0xff] }
 0x170   :  { %v3756_v47 = vpop.f32.mrf.mxu0  ;;  %v2898_v27 = vadd.f32 %v2897_v24, %v2613_v5  ;;  %v2186_v56 = vadd.f32 %v5308_v0, %v2185_v63  ;;  %4034 = vmatpush3.msra.mxu1 %v2991_v57 }
 0x171   :  { %v2488_v23 = vmax.f32 %v1546_v3, 0.0  ;;  %v2752_v33 = vadd.f32 %v2751_v16, %v2487_v11  ;;  %v1561_v50 = vadd.f32 %v5308_v0, %v3756_v47  ;;  %v3948_v58 = vpop.f32.mrf.mxu1  ;;  %v2617_v11 = vmax.f32 %v2191_v9, 0.0  ;;  %4035 = vmatprep.subr.mxu1 %v4050_v35 }
 0x172   :  { %v1555_v31 = vpop.f32.mrf.mxu0  ;;  %v2899_v1 = vadd.f32 %v2898_v27, %v2614_v36  ;;  %v2616_v16 = vmax.f32 %v2186_v56, 0.0  ;;  %v2201_v21 = vadd.f32 %v5308_v0, %v3948_v58  ;;  %4036 = vmatpush3.msra.mxu1 %v2990_v43 }
 0x173   :  { %v2753_v55 = vadd.f32 %v2752_v33, %v2488_v23  ;;  %v1556_v40 = vadd.f32 %v5308_v0, %v1555_v31  ;;  %v2491_v47 = vmax.f32 %v1561_v50, 0.0  ;;  %v2195_v23 = vpop.f32.mrf.mxu1  ;;  %v2989_v33 = vld [vmem:[%s5574_s3 + $0x8] sm:$0xff]  ;;  %4037 = vmatprep.subr.mxu1 %v4050_v35 }
 0x174   :  { %v3759_v46 = vpop.f32.mrf.mxu0  ;;  %v2900_v3 = vadd.f32 %v2899_v1, %v2615_v52  ;;  %v2196_v52 = vadd.f32 %v5308_v0, %v2195_v23  ;;  %4038 = vmatpush3.msra.mxu1 %v2989_v33 }
 0x175   :  { %v2490_v15 = vmax.f32 %v1556_v40, 0.0  ;;  %v2754_v5 = vadd.f32 %v2753_v55, %v2489_v32  ;;  %v1571_v54 = vadd.f32 %v5308_v0, %v3759_v46  ;;  %v3951_v9 = vpop.f32.mrf.mxu1  ;;  %v2988_v55 = vld [vmem:[%s5574_s3] sm:$0xff]  ;;  %v2619_v40 = vmax.f32 %v2201_v21, 0.0  ;;  %4039 = vmatprep.subr.mxu1 %v4050_v35 }
 0x176   :  { %v1565_v14 = vpop.f32.mrf.mxu0  ;;  %v2901_v31 = vadd.f32 %v2900_v3, %v2616_v16  ;;  %v2618_v63 = vmax.f32 %v2196_v52, 0.0  ;;  %v2211_v57 = vadd.f32 %v5308_v0, %v3951_v9  ;;  %4040 = vmatpush3.msra.mxu1 %v2988_v55 }
 0x177   :  { %v2755_v24 = vadd.f32 %v2754_v5, %v2490_v15  ;;  %v1566_v32 = vadd.f32 %v5308_v0, %v1565_v14  ;;  %v2493_v46 = vmax.f32 %v1571_v54, 0.0  ;;  %v2205_v5 = vpop.f32.mrf.mxu1 }
 0x178   :  { %v3762_v20 = vpop.f32.mrf.mxu0  ;;  %v2902_v12 = vadd.f32 %v2901_v31, %v2617_v11  ;;  %v2206_v14 = vadd.f32 %v5308_v0, %v2205_v5 }
 0x179   :  { %v2492_v36 = vmax.f32 %v1566_v32, 0.0  ;;  %v2756_v27 = vadd.f32 %v2755_v24, %v2491_v47  ;;  %v1581_v56 = vadd.f32 %v5308_v0, %v3762_v20  ;;  %v3954_v11 = vpop.f32.mrf.mxu1  ;;  %v2621_v47 = vmax.f32 %v2211_v57, 0.0 }
 0x17a   :  { %v1575_v50 = vpop.f32.mrf.mxu0  ;;  %v2903_v43 = vadd.f32 %v2902_v12, %v2618_v63  ;;  %v2620_v24 = vmax.f32 %v2206_v14, 0.0  ;;  %v2221_v32 = vadd.f32 %v5308_v0, %v3954_v11 }
 0x17b   :  { %v2757_v1 = vadd.f32 %v2756_v27, %v2492_v36  ;;  %v1576_v15 = vadd.f32 %v5308_v0, %v1575_v50  ;;  %v2495_v23 = vmax.f32 %v1581_v56, 0.0  ;;  %v2215_v31 = vpop.f32.mrf.mxu1 }
 0x17c   :  { %v3765_v58 = vpop.f32.mrf.mxu0  ;;  %v2904_v54 = vadd.f32 %v2903_v43, %v2619_v40  ;;  %v2216_v27 = vadd.f32 %v5308_v0, %v2215_v31  ;;  %v2623_v12 = vmax.f32 %v2221_v32, 0.0 }
 0x17d   :  { %v2494_v16 = vmax.f32 %v1576_v15, 0.0  ;;  %v2758_v3 = vadd.f32 %v2757_v1, %v2493_v46  ;;  %v1591_v20 = vadd.f32 %v5308_v0, %v3765_v58  ;;  %v3957_v50 = vpop.f32.mrf.mxu1 }
 0x17e   :  { %v1585_v21 = vpop.f32.mrf.mxu0  ;;  %v2905_v36 = vadd.f32 %v2904_v54, %v2620_v24  ;;  %v2622_v57 = vmax.f32 %v2216_v27, 0.0  ;;  %v2231_v46 = vadd.f32 %v5308_v0, %v3957_v50 }
 0x17f   :  { %v2759_v33 = vadd.f32 %v2758_v3, %v2494_v16  ;;  %v1586_v35 = vadd.f32 %v5308_v0, %v1585_v21  ;;  %v2497_v1 = vmax.f32 %v1591_v20, 0.0  ;;  %v2225_v58 = vpop.f32.mrf.mxu1 }
 0x180   :  { %v3768_v52 = vpop.f32.mrf.mxu0  ;;  %v2906_v40 = vadd.f32 %v2905_v36, %v2621_v47  ;;  %v2226_v16 = vadd.f32 %v5308_v0, %v2225_v58  ;;  %v2625_v54 = vmax.f32 %v2231_v46, 0.0 }
 0x181   :  { %v2496_v9 = vmax.f32 %v1586_v35, 0.0  ;;  %v2760_v55 = vadd.f32 %v2759_v33, %v2495_v23  ;;  %v1601_v15 = vadd.f32 %v5308_v0, %v3768_v52  ;;  %v3960_v21 = vpop.f32.mrf.mxu1 }
 0x182   :  { %v1595_v63 = vpop.f32.mrf.mxu0  ;;  %v2907_v14 = vadd.f32 %v2906_v40, %v2622_v57  ;;  %v2624_v32 = vmax.f32 %v2226_v16, 0.0  ;;  %v2241_v23 = vadd.f32 %v5308_v0, %v3960_v21 }
 0x183   :  { %v2761_v56 = vadd.f32 %v2760_v55, %v2496_v9  ;;  %v1596_v5 = vadd.f32 %v5308_v0, %v1595_v63  ;;  %v2499_v33 = vmax.f32 %v1601_v15, 0.0  ;;  %v2235_v52 = vpop.f32.mrf.mxu1 }
 0x184   :  { %v3771_v43 = vpop.f32.mrf.mxu0  ;;  %v2908_v47 = vadd.f32 %v2907_v14, %v2623_v12  ;;  %v2236_v9 = vadd.f32 %v5308_v0, %v2235_v52  ;;  %v2627_v63 = vmax.f32 %v2241_v23, 0.0 }
 0x185   :  { %v2498_v3 = vmax.f32 %v1596_v5, 0.0  ;;  %v2762_v11 = vadd.f32 %v2761_v56, %v2497_v1  ;;  %v1611_v35 = vadd.f32 %v5308_v0, %v3771_v43  ;;  %v3963_v57 = vpop.f32.mrf.mxu1 }
 0x186   :  { %v1605_v24 = vpop.f32.mrf.mxu0  ;;  %v2909_v27 = vadd.f32 %v2908_v47, %v2624_v32  ;;  %v2626_v46 = vmax.f32 %v2236_v9, 0.0  ;;  %v2251_v56 = vadd.f32 %v5308_v0, %v3963_v57 }
 0x187   :  { %v2763_v20 = vadd.f32 %v2762_v11, %v2498_v3  ;;  %v1606_v31 = vadd.f32 %v5308_v0, %v1605_v24  ;;  %v2501_v5 = vmax.f32 %v1611_v35, 0.0  ;;  %v2245_v43 = vpop.f32.mrf.mxu1 }
 0x188   :  { %v3774_v36 = vpop.f32.mrf.mxu0  ;;  %v2910_v1 = vadd.f32 %v2909_v27, %v2625_v54  ;;  %v2629_v3 = vmax.f32 %v2251_v56, 0.0  ;;  %v2246_v11 = vadd.f32 %v5308_v0, %v2245_v43 }
 0x189   :  { %v2764_v55 = vadd.f32 %v2763_v20, %v2499_v33  ;;  %v2500_v50 = vmax.f32 %v1606_v31, 0.0  ;;  %v1621_v40 = vadd.f32 %v5308_v0, %v3774_v36  ;;  %v3966_v47 = vpop.f32.mrf.mxu1 }
 0x18a   :  { %v1615_v12 = vpop.f32.mrf.mxu0  ;;  %v2911_v16 = vadd.f32 %v2910_v1, %v2626_v46  ;;  %v2628_v54 = vmax.f32 %v2246_v11, 0.0  ;;  %v2261_v31 = vadd.f32 %v5308_v0, %v3966_v47 }
 0x18b   :  { %v2765_v15 = vrot.slane %v2764_v55, 4  ;;  %v1616_v58 = vadd.f32 %v5308_v0, %v1615_v12  ;;  %v2771_v24 = vadd.f32 %v2501_v5, %v2500_v50  ;;  %v2503_v23 = vmax.f32 %v1621_v40, 0.0  ;;  %v2255_v9 = vpop.f32.mrf.mxu1 }
 0x18c   :  { %v3777_v14 = vpop.f32.mrf.mxu0  ;;  %v5424_v20 = vadd.f32 %v2911_v16, %v2627_v63  ;;  %v2919_v12 = vadd.f32 %v2629_v3, %v2628_v54 }
 0x18d   :  { %v2766_v21 = vadd.f32 %v2765_v15, %v2764_v55  ;;  %v2502_v32 = vmax.f32 %v1616_v58, 0.0  ;;  %v1631_v36 = vadd.f32 %v5308_v0, %v3777_v14  ;;  %v2256_v55 = vadd.f32 %v5308_v0, %v2255_v9  ;;  %v3969_v1 = vpop.f32.mrf.mxu1 }
 0x18e   :  { %v1625_v33 = vpop.f32.mrf.mxu0  ;;  %v2631_v15 = vmax.f32 %v2261_v31, 0.0  ;;  %v2271_v58 = vadd.f32 %v5308_v0, %v3969_v1 }
 0x18f   :  { %v2767_v35 = vrot.slane %v2766_v21, 2  ;;  %v2772_v52 = vadd.f32 %v2771_v24, %v2502_v32  ;;  %v1626_v27 = vadd.f32 %v5308_v0, %v1625_v33  ;;  %v2630_v5 = vmax.f32 %v2256_v55, 0.0  ;;  %v2265_v24 = vpop.f32.mrf.mxu1 }
 0x190   :  { %v3780_v57 = vpop.f32.mrf.mxu0  ;;  %v2505_v14 = vmax.f32 %v1631_v36, 0.0 }
 0x191   :  { %v2768_v50 = vadd.f32 %v2767_v35, %v2766_v21  ;;  %v2504_v46 = vmax.f32 %v1626_v27, 0.0  ;;  %v2773_v40 = vadd.f32 %v2772_v52, %v2503_v23  ;;  %v1641_v63 = vadd.f32 %v5308_v0, %v3780_v57  ;;  %v3972_v35 = vpop.f32.mrf.mxu1 }
 0x192   :  { %v1635_v56 = vpop.f32.mrf.mxu0  ;;  %v2920_v32 = vadd.f32 %v2919_v12, %v2630_v5  ;;  %v2266_v21 = vadd.f32 %v5308_v0, %v2265_v24  ;;  %v2633_v52 = vmax.f32 %v2271_v58, 0.0  ;;  %v2281_v36 = vadd.f32 %v5308_v0, %v3972_v35 }
 0x193   :  { %v2769_v43 = vrot.slane %v2768_v50, 1  ;;  %v2774_v16 = vadd.f32 %v2773_v40, %v2504_v46  ;;  %v1636_v11 = vadd.f32 %v5308_v0, %v1635_v56  ;;  %v2507_v23 = vmax.f32 %v1641_v63, 0.0  ;;  %v2275_v12 = vpop.f32.mrf.mxu1 }
 0x194   :  { %v3783_v3 = vpop.f32.mrf.mxu0  ;;  %v2632_v27 = vmax.f32 %v2266_v21, 0.0  ;;  %v2921_v9 = vadd.f32 %v2920_v32, %v2631_v15 }
 0x195   :  { %v2770_v47 = vadd.f32 %v2769_v43, %v2768_v50  ;;  %v2506_v33 = vmax.f32 %v1636_v11, 0.0  ;;  %v2775_v54 = vadd.f32 %v2774_v16, %v2505_v14  ;;  %v1651_v46 = vadd.f32 %v5308_v0, %v3783_v3  ;;  %v3975_v15 = vpop.f32.mrf.mxu1 }
 0x196   :  { %v1645_v31 = vpop.f32.mrf.mxu0  ;;  %v2922_v56 = vadd.f32 %v2921_v9, %v2632_v27  ;;  %v2276_v50 = vadd.f32 %v5308_v0, %v2275_v12  ;;  %v2635_v14 = vmax.f32 %v2281_v36, 0.0  ;;  %v2291_v35 = vadd.f32 %v5308_v0, %v3975_v15 }
 0x197   :  { %v2958_v57 = vmul.f32 0.00390625, %v2770_v47  ;;  %v2776_v55 = vadd.f32 %v2775_v54, %v2506_v33  ;;  %v1646_v40 = vadd.f32 %v5308_v0, %v1645_v31  ;;  %v2509_v24 = vmax.f32 %v1651_v46, 0.0  ;;  %v2285_v47 = vpop.f32.mrf.mxu1 }
 0x198   :  { %v3786_v1 = vpop.f32.mrf.mxu0  ;;  %v2634_v16 = vmax.f32 %v2276_v50, 0.0  ;;  %v2923_v11 = vadd.f32 %v2922_v56, %v2633_v52  ;;  %v2637_v56 = vmax.f32 %v2291_v35, 0.0 }
 0x199   :  { %v5440_v63 = vsel %vm2974_vm4, %v2958_v57, %v5350_v2  ;;  %v2508_v5 = vmax.f32 %v1646_v40, 0.0  ;;  %v2777_v58 = vadd.f32 %v2776_v55, %v2507_v23  ;;  %v1661_v32 = vadd.f32 %v5308_v0, %v3786_v1  ;;  %v3978_v27 = vpop.f32.mrf.mxu1 }
 0x19a   :  { %v1655_v43 = vpop.f32.mrf.mxu0  ;;  %v2924_v54 = vadd.f32 %v2923_v11, %v2634_v16  ;;  %v2286_v2 = vadd.f32 %v5308_v0, %v2285_v47 }
 0x19b   :  { %v2778_v3 = vadd.f32 %v2777_v58, %v2508_v5  ;;  %v1656_v21 = vadd.f32 %v5308_v0, %v1655_v43  ;;  %v2511_v52 = vmax.f32 %v1661_v32, 0.0  ;;  %v2295_v12 = vpop.f32.mrf.mxu1 }
 0x19c   :  { %v3789_v33 = vpop.f32.mrf.mxu0  ;;  %v2636_v36 = vmax.f32 %v2286_v2, 0.0  ;;  %v2925_v57 = vadd.f32 %v2924_v54, %v2635_v14  ;;  %v2296_v5 = vadd.f32 %v5308_v0, %v2295_v12 }
 0x19d   :  { %v2510_v31 = vmax.f32 %v1656_v21, 0.0  ;;  %v2779_v23 = vadd.f32 %v2778_v3, %v2509_v24  ;;  %v1671_v46 = vadd.f32 %v5308_v0, %v3789_v33  ;;  %v3981_v43 = vpop.f32.mrf.mxu1  ;;  %v2301_v21 = vadd.f32 %v5308_v0, %v3978_v27 }
 0x19e   :  { %v1665_v9 = vpop.f32.mrf.mxu0  ;;  %v2926_v50 = vadd.f32 %v2925_v57, %v2636_v36  ;;  %v2638_v47 = vmax.f32 %v2296_v5, 0.0 }
 0x19f   :  { %v2780_v55 = vadd.f32 %v2779_v23, %v2510_v31  ;;  %v1666_v40 = vadd.f32 %v5308_v0, %v1665_v9  ;;  %v2513_v11 = vmax.f32 %v1671_v46, 0.0  ;;  %v2305_v2 = vpop.f32.mrf.mxu1 }
 0x1a0   :  { %v3792_v1 = vpop.f32.mrf.mxu0  ;;  %v2927_v33 = vadd.f32 %v2926_v50, %v2637_v56 }
 0x1a1   :  { %v2512_v58 = vmax.f32 %v1666_v40, 0.0  ;;  %v2781_v15 = vadd.f32 %v2780_v55, %v2511_v52  ;;  %v1681_v14 = vadd.f32 %v5308_v0, %v3792_v1  ;;  %v2639_v55 = vmax.f32 %v2301_v21, 0.0  ;;  %v3984_v27 = vpop.f32.mrf.mxu1 }
 0x1a2   :  { %v1675_v16 = vpop.f32.mrf.mxu0  ;;  %v2928_v46 = vadd.f32 %v2927_v33, %v2638_v47  ;;  %v2306_v40 = vadd.f32 %v5308_v0, %v2305_v2 }
 0x1a3   :  { %v2782_v24 = vadd.f32 %v2781_v15, %v2512_v58  ;;  %v1676_v3 = vadd.f32 %v5308_v0, %v1675_v16  ;;  %v2515_v23 = vmax.f32 %v1681_v14, 0.0  ;;  %v2315_v21 = vpop.f32.mrf.mxu1 }
 0x1a4   :  { %v3795_v32 = vpop.f32.mrf.mxu0  ;;  %v2929_v14 = vadd.f32 %v2928_v46, %v2639_v55 }
 0x1a5   :  { %v2514_v54 = vmax.f32 %v1676_v3, 0.0  ;;  %v2783_v35 = vadd.f32 %v2782_v24, %v2513_v11  ;;  %v1691_v36 = vadd.f32 %v5308_v0, %v3795_v32  ;;  %v2311_v11 = vadd.f32 %v5308_v0, %v3981_v43  ;;  %v3987_v43 = vpop.f32.mrf.mxu1 }
 0x1a6   :  { %v1685_v31 = vpop.f32.mrf.mxu0  ;;  %v2640_v24 = vmax.f32 %v2306_v40, 0.0 }
 0x1a7   :  { %v2784_v9 = vadd.f32 %v2783_v35, %v2514_v54  ;;  %v1686_v57 = vadd.f32 %v5308_v0, %v1685_v31  ;;  %v2517_v56 = vmax.f32 %v1691_v36, 0.0  ;;  %v2316_v36 = vadd.f32 %v5308_v0, %v2315_v21  ;;  %v5468_v21 = vld [vmem:[%s5575_s2] ss:$0 sm:$0xff] }
 0x1a8   :  { %v3798_v52 = vpop.f32.mrf.mxu0 }
 0x1a9   :  { %v2516_v12 = vmax.f32 %v1686_v57, 0.0  ;;  %v2785_v1 = vadd.f32 %v2784_v9, %v2515_v23  ;;  %v1701_v58 = vadd.f32 %v5308_v0, %v3798_v52  ;;  %v2641_v23 = vmax.f32 %v2311_v11, 0.0  ;;  %v2325_v11 = vpop.f32.mrf.mxu1 }
 0x1aa   :  { %v1695_v5 = vpop.f32.mrf.mxu0  ;;  %v2930_v9 = vadd.f32 %v2929_v14, %v2640_v24 }
 0x1ab   :  { %v2786_v50 = vadd.f32 %v2785_v1, %v2516_v12  ;;  %v1696_v15 = vadd.f32 %v5308_v0, %v1695_v5  ;;  %v2519_v33 = vmax.f32 %v1701_v58, 0.0 }
 0x1ac   :  { %v3801_v16 = vpop.f32.mrf.mxu0  ;;  %v2931_v58 = vadd.f32 %v2930_v9, %v2641_v23  ;;  %v3990_v23 = vpop.f32.mrf.mxu1 }
 0x1ad   :  { %v2518_v3 = vmax.f32 %v1696_v15, 0.0  ;;  %v2787_v32 = vadd.f32 %v2786_v50, %v2517_v56  ;;  %v1711_v35 = vadd.f32 %v5308_v0, %v3801_v16  ;;  %v2321_v56 = vadd.f32 %v5308_v0, %v3984_v27 }
 0x1ae   :  { %v1705_v47 = vpop.f32.mrf.mxu0  ;;  %v2642_v50 = vmax.f32 %v2316_v36, 0.0 }
 0x1af   :  { %v2788_v54 = vadd.f32 %v2787_v32, %v2518_v3  ;;  %v1706_v2 = vadd.f32 %v5308_v0, %v1705_v47  ;;  %v2521_v55 = vmax.f32 %v1711_v35, 0.0  ;;  %v2326_v35 = vadd.f32 %v5468_v21, %v2325_v11 }
 0x1b0   :  { %v3804_v31 = vpop.f32.mrf.mxu0  ;;  %v2932_v27 = vadd.f32 %v2931_v58, %v2642_v50 }
 0x1b1   :  { %v2520_v57 = vmax.f32 %v1706_v2, 0.0  ;;  %v2789_v52 = vadd.f32 %v2788_v54, %v2519_v33  ;;  %v1721_v12 = vadd.f32 %v5308_v0, %v3804_v31  ;;  %v2643_v54 = vmax.f32 %v2321_v56, 0.0  ;;  %v2335_v56 = vpop.f32.mrf.mxu1 }
 0x1b2   :  { %v1715_v40 = vpop.f32.mrf.mxu0 }
 0x1b3   :  { %v2790_v46 = vadd.f32 %v2789_v52, %v2520_v57  ;;  %v1716_v1 = vadd.f32 %v5308_v0, %v1715_v40  ;;  %v2523_v14 = vmax.f32 %v1721_v12, 0.0  ;;  %v2933_v12 = vadd.f32 %v2932_v27, %v2643_v54 }
 0x1b4   :  { %v3807_v5 = vpop.f32.mrf.mxu0 }
 0x1b5   :  { %v2522_v15 = vmax.f32 %v1716_v1, 0.0  ;;  %v2791_v16 = vadd.f32 %v2790_v46, %v2521_v55  ;;  %v1731_v32 = vadd.f32 %v5308_v0, %v3807_v5  ;;  %v2331_v55 = vadd.f32 %v5468_v21, %v3987_v43  ;;  %v3993_v43 = vpop.f32.mrf.mxu1 }
 0x1b6   :  { %v1725_v24 = vpop.f32.mrf.mxu0  ;;  %v2644_v46 = vmax.f32 %v2326_v35, 0.0 }
 0x1b7   :  { %v2792_v3 = vadd.f32 %v2791_v16, %v2522_v15  ;;  %v1726_v47 = vadd.f32 %v5468_v21, %v1725_v24  ;;  %v2525_v36 = vmax.f32 %v1731_v32, 0.0  ;;  %v2336_v32 = vadd.f32 %v5468_v21, %v2335_v56 }
 0x1b8   :  { %v3810_v33 = vpop.f32.mrf.mxu0 }
 0x1b9   :  { %v2524_v2 = vmax.f32 %v1726_v47, 0.0  ;;  %v2793_v31 = vadd.f32 %v2792_v3, %v2523_v14  ;;  %v1741_v0 = vadd.f32 %v5468_v21, %v3810_v33  ;;  %v2645_v14 = vmax.f32 %v2331_v55, 0.0 }
 0x1ba   :  { %v1735_v9 = vpop.f32.mrf.mxu0  ;;  %v2934_v3 = vadd.f32 %v2933_v12, %v2644_v46  ;;  %v2345_v46 = vpop.f32.mrf.mxu1 }
 0x1bb   :  { %v2794_v57 = vadd.f32 %v2793_v31, %v2524_v2  ;;  %v1736_v52 = vadd.f32 %v5468_v21, %v1735_v9  ;;  %v2527_v58 = vmax.f32 %v1741_v0, 0.0 }
 0x1bc   :  { %v3813_v40 = vpop.f32.mrf.mxu0  ;;  %v2935_v0 = vadd.f32 %v2934_v3, %v2645_v14  ;;  %v3996_v3 = vpop.f32.mrf.mxu1 }
 0x1bd   :  { %v2526_v1 = vmax.f32 %v1736_v52, 0.0  ;;  %v2795_v5 = vadd.f32 %v2794_v57, %v2525_v36  ;;  %v1751_v16 = vadd.f32 %v5468_v21, %v3813_v40  ;;  %v2341_v36 = vadd.f32 %v5468_v21, %v3990_v23 }
 0x1be   :  { %v1745_v50 = vpop.f32.mrf.mxu0  ;;  %v2646_v57 = vmax.f32 %v2336_v32, 0.0  ;;  %v1781_v23 = vadd.f32 %v5468_v21, %v4921_v30 }
 0x1bf   :  { %v2796_v15 = vadd.f32 %v2795_v5, %v2526_v1  ;;  %v1746_v11 = vadd.f32 %v5468_v21, %v1745_v50  ;;  %v2529_v54 = vmax.f32 %v1751_v16, 0.0  ;;  %v1776_v1 = vadd.f32 %v5468_v21, %v4933_v39 }
 0x1c0   :  { %v3816_v24 = vpop.f32.mrf.mxu0  ;;  %v2346_v16 = vadd.f32 %v5468_v21, %v2345_v46 }
 0x1c1   :  { %v2528_v47 = vmax.f32 %v1746_v11, 0.0  ;;  %v2797_v33 = vadd.f32 %v2796_v15, %v2527_v58  ;;  %v1761_v2 = vadd.f32 %v5468_v21, %v3816_v24  ;;  %v2647_v58 = vmax.f32 %v2341_v36, 0.0  ;;  %v2355_v36 = vpop.f32.mrf.mxu1 }
 0x1c2   :  { %v1755_v35 = vpop.f32.mrf.mxu0  ;;  %v2936_v15 = vadd.f32 %v2935_v0, %v2646_v57  ;;  %v2534_v32 = vmax.f32 %v1776_v1, 0.0  ;;  %v1796_v0 = vadd.f32 %v5468_v21, %v4977_v4  ;;  %v2356_v46 = vadd.f32 %v5468_v21, %v2355_v36 }
 0x1c3   :  { %v2798_v27 = vadd.f32 %v2797_v33, %v2528_v47  ;;  %v1756_v31 = vadd.f32 %v5468_v21, %v1755_v35  ;;  %v2531_v5 = vmax.f32 %v1761_v2, 0.0  ;;  %v1786_v47 = vadd.f32 %v5468_v21, %v4955_v53 }
 0x1c4   :  { %v3819_v9 = vpop.f32.mrf.mxu0  ;;  %v2351_v35 = vadd.f32 %v5468_v21, %v3993_v43  ;;  %v2535_v2 = vmax.f32 %v1781_v23, 0.0  ;;  %v2361_v4 = vadd.f32 %v5468_v21, %v3996_v3  ;;  %v1826_v36 = vadd.f32 %v5468_v21, %v5047_v51 }
 0x1c5   :  { %v2530_v52 = vmax.f32 %v1756_v31, 0.0  ;;  %v2799_v40 = vadd.f32 %v2798_v27, %v2529_v54  ;;  %v1771_v55 = vadd.f32 %v5468_v21, %v3819_v9  ;;  %v2648_v54 = vmax.f32 %v2346_v16, 0.0 }
 0x1c6   :  { %v1765_v12 = vpop.f32.mrf.mxu0  ;;  %v2937_v27 = vadd.f32 %v2936_v15, %v2647_v58  ;;  %v1791_v31 = vadd.f32 %v5468_v21, %v4943_v45  ;;  %v2536_v57 = vmax.f32 %v1786_v47, 0.0  ;;  %v2649_v53 = vmax.f32 %v2351_v35, 0.0  ;;  %v3999_v45 = vpop.f32.mrf.mxu1 }
 0x1c7   :  { %v2800_v56 = vadd.f32 %v2799_v40, %v2530_v52  ;;  %v1766_v50 = vadd.f32 %v5468_v21, %v1765_v12  ;;  %v2533_v24 = vmax.f32 %v1771_v55, 0.0  ;;  %v1801_v12 = vadd.f32 %v5468_v21, %v4965_v59 }
 0x1c8   :  { %v2938_v55 = vadd.f32 %v2937_v27, %v2648_v54  ;;  %v2537_v43 = vmax.f32 %v1791_v31, 0.0  ;;  %v2650_v16 = vmax.f32 %v2356_v46, 0.0  ;;  %v2365_v59 = vpop.f32.mrf.mxu1  ;;  %v2651_v35 = vmax.f32 %v2361_v4, 0.0 }
 0x1c9   :  { %v2801_v11 = vadd.f32 %v2800_v56, %v2531_v5  ;;  %v2532_v14 = vmax.f32 %v1766_v50, 0.0  ;;  %v2538_v56 = vmax.f32 %v1796_v0, 0.0  ;;  %v1806_v50 = vadd.f32 %v5468_v21, %v5002_v19 }
 0x1ca   :  { %v2939_v23 = vadd.f32 %v2938_v55, %v2649_v53  ;;  %v2366_v3 = vadd.f32 %v5468_v21, %v2365_v59  ;;  %v1831_v53 = vadd.f32 %v5468_v21, %v5035_v42  ;;  %v2544_v46 = vmax.f32 %v1826_v36, 0.0 }
 0x1cb   :  { %v2802_v39 = vrot.slane %v2801_v11, 4  ;;  %v2808_v33 = vadd.f32 %v2533_v24, %v2532_v14  ;;  %v1811_v24 = vadd.f32 %v5468_v21, %v4987_v10  ;;  %v2540_v47 = vmax.f32 %v1806_v50, 0.0 }
 0x1cc   :  { %v2940_v54 = vadd.f32 %v2939_v23, %v2650_v16  ;;  %v2652_v0 = vmax.f32 %v2366_v3, 0.0  ;;  %v1846_v42 = vadd.f32 %v5468_v21, %v5095_v22 }
 0x1cd   :  { %v2803_v9 = vadd.f32 %v2802_v39, %v2801_v11  ;;  %v2809_v30 = vadd.f32 %v2808_v33, %v2534_v32  ;;  %v2539_v11 = vmax.f32 %v1801_v12, 0.0  ;;  %v1816_v39 = vadd.f32 %v5468_v21, %v5025_v34 }
 0x1ce   :  { %v2541_v27 = vmax.f32 %v1811_v24, 0.0 }
 0x1cf   :  { %v2804_v52 = vrot.slane %v2803_v9, 2  ;;  %v2810_v40 = vadd.f32 %v2809_v30, %v2535_v2  ;;  %v1821_v2 = vadd.f32 %v5468_v21, %v5013_v25  ;;  %v2542_v30 = vmax.f32 %v1816_v39, 0.0 }
 0x1d1   :  { %v2805_v1 = vadd.f32 %v2804_v52, %v2803_v9  ;;  %v2811_v5 = vadd.f32 %v2810_v40, %v2536_v57  ;;  %v4002_v9 = vpop.f32.mrf.mxu1  ;;  %v2371_v57 = vadd.f32 %v5468_v21, %v3999_v45  ;;  %v2941_v52 = vadd.f32 %v2940_v54, %v2651_v35 }
 0x1d2   :  { %v2543_v40 = vmax.f32 %v1821_v2, 0.0  ;;  %v1841_v45 = vadd.f32 %v5468_v21, %v5060_v60  ;;  %v2381_v4 = vadd.f32 %v5468_v21, %v4002_v9  ;;  %v1856_v60 = vadd.f32 %v5468_v21, %v5117_v41 }
 0x1d3   :  { %v2806_v58 = vrot.slane %v2805_v1, 1  ;;  %v2812_v15 = vadd.f32 %v2811_v5, %v2537_v43  ;;  %v2375_v25 = vpop.f32.mrf.mxu1  ;;  %v2653_v12 = vmax.f32 %v2371_v57, 0.0  ;;  %v2545_v5 = vmax.f32 %v1831_v53, 0.0 }
 0x1d4   :  { %v2376_v51 = vadd.f32 %v5468_v21, %v2375_v25  ;;  %v2547_v23 = vmax.f32 %v1841_v45, 0.0  ;;  %v2550_v3 = vmax.f32 %v1856_v60, 0.0 }
 0x1d5   :  { %v2807_v14 = vadd.f32 %v2806_v58, %v2805_v1  ;;  %v2813_v32 = vadd.f32 %v2812_v15, %v2538_v56  ;;  %v2942_v1 = vadd.f32 %v2941_v52, %v2652_v0  ;;  %v4005_v50 = vpop.f32.mrf.mxu1 }
 0x1d6   :  { %v2654_v16 = vmax.f32 %v2376_v51, 0.0  ;;  %v2391_v2 = vadd.f32 %v5468_v21, %v4005_v50  ;;  %v1891_v51 = vadd.f32 %v5468_v21, %v5175_v26 }
 0x1d7   :  { %v2959_v33 = vmul.f32 0.00390625, %v2807_v14  ;;  %v2814_v19 = vadd.f32 %v2813_v32, %v2539_v11  ;;  %v1851_v11 = vadd.f32 %v5468_v21, %v5083_v13  ;;  %v2385_v14 = vpop.f32.mrf.mxu1  ;;  %v2548_v32 = vmax.f32 %v1846_v42, 0.0 }
 0x1d8   :  { %v2386_v22 = vadd.f32 %v5468_v21, %v2385_v14  ;;  %v1866_v13 = vadd.f32 %v5468_v21, %v5139_v61  ;;  %v2657_v52 = vmax.f32 %v2391_v2, 0.0  ;;  %v2557_v42 = vmax.f32 %v1891_v51, 0.0 }
 0x1d9   :  { %v5509_v10 = vsel %vm2976_vm5, %v2959_v33, %v5440_v63  ;;  %v2815_v31 = vadd.f32 %v2814_v19, %v2540_v47  ;;  %v1836_v63 = vadd.f32 %v5468_v21, %v5073_v6  ;;  %v2943_v6 = vadd.f32 %v2942_v1, %v2653_v12  ;;  %v4008_v54 = vpop.f32.mrf.mxu1 }
 0x1da   :  { %v2655_v47 = vmax.f32 %v2381_v4, 0.0  ;;  %v2549_v33 = vmax.f32 %v1851_v11, 0.0  ;;  %v1861_v19 = vadd.f32 %v5468_v21, %v5105_v29  ;;  %v2552_v57 = vmax.f32 %v1866_v13, 0.0 }
 0x1db   :  { %v2816_v34 = vadd.f32 %v2815_v31, %v2541_v27  ;;  %v2546_v58 = vmax.f32 %v1836_v63, 0.0  ;;  %v2944_v39 = vadd.f32 %v2943_v6, %v2654_v16  ;;  %v2656_v31 = vmax.f32 %v2386_v22, 0.0 }
 0x1dc   :  { %v2551_v9 = vmax.f32 %v1861_v19, 0.0  ;;  %v1876_v29 = vadd.f32 %v5468_v21, %v5165_v17  ;;  %v1906_v16 = vadd.f32 %v5468_v21, %v5228_v18  ;;  %v1911_v11 = vadd.f32 %v5468_v21, %v5219_v8 }
 0x1dd   :  { %v2817_v55 = vadd.f32 %v2816_v34, %v2542_v30  ;;  %v2945_v41 = vadd.f32 %v2944_v39, %v2655_v47  ;;  %v1871_v30 = vadd.f32 %v5468_v21, %v5127_v49  ;;  %v2395_v34 = vpop.f32.mrf.mxu1  ;;  %v1886_v49 = vadd.f32 %v5468_v21, %v5187_v38 }
 0x1de   :  { %v2396_v61 = vadd.f32 %v5468_v21, %v2395_v34  ;;  %v1901_v38 = vadd.f32 %v5468_v21, %v5197_v48  ;;  %v2560_v14 = vmax.f32 %v1906_v16, 0.0  ;;  %v2913_v48 = vrot.slane %v5424_v20, 4 }
 0x1df   :  { %v2818_v43 = vadd.f32 %v2817_v55, %v2543_v40  ;;  %v2946_v40 = vadd.f32 %v2945_v41, %v2656_v31  ;;  %v2553_v53 = vmax.f32 %v1871_v30, 0.0  ;;  %v1881_v55 = vadd.f32 %v5468_v21, %v5152_v7 }
 0x1e0   :  { %v2658_v12 = vmax.f32 %v2396_v61, 0.0  ;;  %v2556_v45 = vmax.f32 %v1886_v49, 0.0  ;;  %v2559_v26 = vmax.f32 %v1901_v38, 0.0  ;;  %v2561_v47 = vmax.f32 %v1911_v11, 0.0 }
 0x1e1   :  { %v2819_v56 = vadd.f32 %v2818_v43, %v2544_v46  ;;  %v2554_v46 = vmax.f32 %v1876_v29, 0.0  ;;  %v2401_v43 = vadd.f32 %v5468_v21, %v4008_v54  ;;  %v2947_v1 = vadd.f32 %v2946_v40, %v2657_v52 }
 0x1e2   :  { %v2555_v17 = vmax.f32 %v1881_v55, 0.0  ;;  %v1921_v18 = vadd.f32 %v5468_v21, %v5235_v28  ;;  %v2914_v8 = vadd.f32 %v2913_v48, %v5424_v20 }
 0x1e3   :  { %v2820_v15 = vadd.f32 %v2819_v56, %v2545_v5  ;;  %v1896_v56 = vadd.f32 %v5468_v21, %v5209_v62  ;;  %v2659_v50 = vmax.f32 %v2401_v43, 0.0  ;;  %v2876_v62 = vrot.slane %v5335_v44, 4 }
 0x1e4   :  { %v2563_v54 = vmax.f32 %v1921_v18, 0.0 }
 0x1e5   :  { %v2821_v24 = vadd.f32 %v2820_v15, %v2546_v58  ;;  %v2948_v58 = vadd.f32 %v2947_v1, %v2658_v12  ;;  %v2558_v4 = vmax.f32 %v1896_v56, 0.0  ;;  %v2877_v22 = vadd.f32 %v2876_v62, %v5335_v44  ;;  %v3348_v12 = vld [vmem:[%s5577_s4] ss:$0 sm:$0xff] }
 0x1e7   :  { %v2822_v59 = vadd.f32 %v2821_v24, %v2547_v23  ;;  %v2949_v23 = vadd.f32 %v2948_v58, %v2659_v50  ;;  %v2878_v13 = vrot.slane %v2877_v22, 2 }
 0x1e9   :  { %v2823_v35 = vadd.f32 %v2822_v59, %v2548_v32  ;;  %v1916_v32 = vadd.f32 %v5468_v21, %v5240_v37  ;;  %v2950_v59 = vrot.slane %v2949_v23, 4  ;;  %v2915_v37 = vrot.slane %v2914_v8, 2 }
 0x1ea   :  { %v2879_v41 = vadd.f32 %v2878_v13, %v2877_v22 }
 0x1eb   :  { %v2824_v27 = vadd.f32 %v2823_v35, %v2549_v33  ;;  %v2562_v33 = vmax.f32 %v1916_v32, 0.0  ;;  %v2951_v35 = vadd.f32 %v2950_v59, %v2949_v23 }
 0x1ec   :  { %v2880_v21 = vrot.slane %v2879_v41, 1 }
 0x1ed   :  { %v2825_v36 = vadd.f32 %v2824_v27, %v2550_v3  ;;  %v2952_v2 = vrot.slane %v2951_v35, 2 }
 0x1ee   :  { %v2881_v20 = vadd.f32 %v2880_v21, %v2879_v41 }
 0x1ef   :  { %v2826_v0 = vadd.f32 %v2825_v36, %v2551_v9  ;;  %v2916_v9 = vadd.f32 %v2915_v37, %v2914_v8  ;;  %v2953_v36 = vadd.f32 %v2952_v2, %v2951_v35 }
 0x1f1   :  { %v2827_v25 = vadd.f32 %v2826_v0, %v2552_v57  ;;  %v2917_v34 = vrot.slane %v2916_v9, 1  ;;  %v2954_v57 = vrot.slane %v2953_v36, 1 }
 0x1f3   :  { %v2828_v63 = vadd.f32 %v2827_v25, %v2553_v53  ;;  %v2918_v0 = vadd.f32 %v2917_v34, %v2916_v9  ;;  %v2955_v40 = vadd.f32 %v2954_v57, %v2953_v36  ;;  %v2961_v53 = vmul.f32 0.00390625, %v2881_v20 }
 0x1f5   :  { %v2829_v5 = vadd.f32 %v2828_v63, %v2554_v46  ;;  %v2962_v55 = vmul.f32 0.00390625, %v2918_v0  ;;  %v2963_v46 = vmul.f32 0.00390625, %v2955_v40 }
 0x1f7   :  { %v2830_v7 = vadd.f32 %v2829_v5, %v2555_v17 }
 0x1f9   :  { %v2831_v15 = vadd.f32 %v2830_v7, %v2556_v45 }
 0x1fb   :  { %v2832_v6 = vadd.f32 %v2831_v15, %v2557_v42 }
 0x1fd   :  { %v2833_v24 = vadd.f32 %v2832_v6, %v2558_v4 }
 0x1ff   :  { %v2834_v60 = vadd.f32 %v2833_v24, %v2559_v26 }
 0x201   :  { %v2835_v39 = vadd.f32 %v2834_v60, %v2560_v14 }
 0x203   :  { %v2836_v19 = vadd.f32 %v2835_v39, %v2561_v47 }
 0x205   :  { %v2837_v3 = vadd.f32 %v2836_v19, %v2562_v33 }
 0x207   :  { %v2838_v27 = vadd.f32 %v2837_v3, %v2563_v54 }
 0x209   :  { %v2839_v31 = vrot.slane %v2838_v27, 4 }
 0x20b   :  { %v2840_v30 = vadd.f32 %v2839_v31, %v2838_v27 }
 0x20d   :  { %v2841_v28 = vrot.slane %v2840_v30, 2 }
 0x20f   :  { %v2842_v44 = vadd.f32 %v2841_v28, %v2840_v30 }
 0x211   :  { %v2843_v29 = vrot.slane %v2842_v44, 1 }
 0x213   :  { %v2844_v52 = vadd.f32 %v2843_v29, %v2842_v44 }
 0x215   :  { %v2960_v61 = vmul.f32 0.00390625, %v2844_v52 }
 0x217   :  { %v2979_v25 = vsel %vm2978_vm6, %v2960_v61, %v5509_v10 }
 0x218   :  { %v2981_v49 = vsel %vm2980_vm7, %v2961_v53, %v2979_v25 }
 0x219   :  { %v2983_v63 = vsel %vm2982_vm8, %v2962_v55, %v2981_v49 }
 0x21a   :  { %v2985_v43 = vsel %vm2984_vm9, %v2963_v46, %v2983_v63 }
 0x21b   :  { %2987 = vst [vmem:[%s5576_s5] sm:$0xff] %v2985_v43  ;;  %4042 = vmatmul.mubr.f32.vlgmr.msra.gmra.mxu1 %v2985_v43 }
 0x2db   :  { %v3077_v1 = vpop.f32.mrf.mxu1 }
 0x2dc   :  { %v3078_v17 = vadd.f32 %v3348_v12, %v3077_v1 }
 0x2dd   :  { %v4043_v51 = vpop.f32.mrf.mxu1 }
 0x2de   :  { %3081 = vst [vmem:[%s5578_s6] sm:$0xff] %v3078_v17 }

</bundles_post_ra>
